<compile_context>
chip_gen: v6e
topology: v6e:2x2x1
jax: 0.10.0
libtpu: 0.0.40
codegen_flags: <defaults>
</compile_context>

<pallas_src>
import functools

import jax
import jax.numpy as jnp
import numpy as np
from jax.experimental import pallas as pl
from jax.experimental.pallas import tpu as pltpu


# ------------------------------- the kernel -------------------------------

def glu_kernel(x_ref, w_ref, b_ref, o_ref, *, d):
    # bf16 MXU feed, f32 accumulate.
    x = x_ref[...].astype(jnp.bfloat16)                           # (TM, D)
    y = jnp.dot(x, w_ref[...], preferred_element_type=jnp.float32)
    y = y + b_ref[...]                                            # (TM, 2D) f32
    gate = y[:, :d]                                               # fc1 branch
    lin = y[:, d:]                                                # fc2 branch
    # sigmoid(gate) = 1 / (1 + exp(-gate)); exp + approx reciprocal both run
    # on the EUP slot (idle otherwise) instead of a VALU divide chain.
    sig = pl.reciprocal(1.0 + jnp.exp(-gate), approx=True)
    o_ref[...] = (sig * lin).astype(o_ref.dtype)


# --------------------------- one-time param packing ---------------------------

def pack_glu_params(w1, b1, w2, b2):
    """Pack fc1/fc2 into one lane-dense operand.  Call ONCE at init time.

    W: (D, 2D) bfloat16 = [w1 | w2],  b: (1, 2D) float32 = [b1 | b2].
    """
    W = jnp.concatenate([w1, w2], axis=1).astype(jnp.bfloat16)
    b = jnp.concatenate([b1, b2], axis=1).astype(jnp.float32)
    return W, b


# ------------------------------- the wrapper -------------------------------

def _pick_row_tile(n_rows, tm_max):
    """Largest row tile that (a) is a multiple of 8, (b) divides the (8-rounded)
    row count exactly, (c) keeps >= 2 grid steps when possible."""
    if n_rows <= 8:
        return n_rows, 0                       # single full-extent block
    pad = (-n_rows) % 8                        # <= 7 rows, only if N % 8 != 0
    np8 = n_rows + pad
    m = np8 // 8
    cap = min(tm_max, np8)
    if np8 // 2 >= 8:
        cap = min(cap, np8 // 2)               # keep >= 2 parallel steps (v7x 2 TCs)
    t_cap = max(1, cap // 8)
    t = 1
    for cand in range(min(m, t_cap), 0, -1):
        if m % cand == 0:
            t = cand
            break
    return 8 * t, pad


def glu_pallas(x, W, b, *, tm=512):
    """x: (..., D); W: (D, 2D) packed bf16; b: (1, 2D) packed f32."""
    orig_shape = x.shape
    D = orig_shape[-1]
    assert W.shape == (D, 2 * D) and b.shape == (1, 2 * D)
    N = int(np.prod(orig_shape[:-1]))
    xf = x.reshape(N, D)

    tm_eff, pad = _pick_row_tile(N, int(tm))
    if pad:  # only hit when N is not a multiple of 8 (tiny <=7-row pad)
        xf = jnp.concatenate([xf, jnp.zeros((pad, D), xf.dtype)], axis=0)
    Np = N + pad

    kernel = functools.partial(glu_kernel, d=D)

    def build(single_buffer_params):
        # Weights / bias have a constant index_map -> never re-DMA'd; single
        # buffering them halves their resident VMEM (matters for large D on v7x).
        extra = dict(pipeline_mode=pl.Buffered(1)) if single_buffer_params else {}
        return pl.pallas_call(
            kernel,
            out_shape=jax.ShapeDtypeStruct((Np, D), x.dtype),
            grid_spec=pltpu.PrefetchScalarGridSpec(
                num_scalar_prefetch=0,
                grid=(Np // tm_eff,),
                in_specs=[
                    pl.BlockSpec((tm_eff, D), lambda r: (r, 0)),            # activations
                    pl.BlockSpec((D, 2 * D), lambda r: (0, 0), **extra),    # packed W (bf16)
                    pl.BlockSpec((1, 2 * D), lambda r: (0, 0), **extra),    # packed b (f32)
                ],
                out_specs=pl.BlockSpec((tm_eff, D), lambda r: (r, 0)),
            ),
            compiler_params=pltpu.CompilerParams(
                dimension_semantics=("parallel",)),
        )

    try:
        out = build(True)(xf, W, b)
    except Exception:
        # Fallback if pipeline_mode=pl.Buffered(1) is rejected by this JAX build.
        out = build(False)(xf, W, b)

    if pad:
        out = out[:N]
    return out.reshape(orig_shape)


# -------------------- pure-JAX reference (for checking) --------------------

def glu_reference(x, w1, b1, w2, b2):
    sig = jax.nn.sigmoid(x @ w1 + b1[0])
    lin = x @ w2 + b2[0]
    return sig * lin


# ------------------------------ parameter init ------------------------------

def init_params(key, D):
    # Matches nn.Linear default init: U(-1/sqrt(in), 1/sqrt(in)) for w and b.
    k1, k2, k3, k4 = jax.random.split(key, 4)
    bound = 1.0 / np.sqrt(D)
    w1 = jax.random.uniform(k1, (D, D), jnp.float32, -bound, bound)
    b1 = jax.random.uniform(k2, (1, D), jnp.float32, -bound, bound)
    w2 = jax.random.uniform(k3, (D, D), jnp.float32, -bound, bound)
    b2 = jax.random.uniform(k4, (1, D), jnp.float32, -bound, bound)
    return w1, b1, w2, b2


# ------------------------------------ main ------------------------------------

if __name__ == "__main__":
    # GLU acts on the last axis (input_dimension = 128, lane-dense); leading
    # dims (batch=4, time=8, space=16) flatten to N=512 rows -> row tile 256,
    # 2 parallel grid steps, no padding, no post-slice.
    B, T, S, D = 4, 8, 16, 128

    key = jax.random.PRNGKey(0)
    kx, kp = jax.random.split(key, 2)
    x = jax.random.normal(kx, (B, T, S, D), jnp.float32)
    w1, b1, w2, b2 = init_params(kp, D)

    # One-time packing (init-time cost, not per call).
    W, b = pack_glu_params(w1, b1, w2, b2)

    out = glu_pallas(x, W, b, tm=512)
    out = jax.block_until_ready(out)

    ref = jax.block_until_ready(glu_reference(x, w1, b1, w2, b2))
    assert out.shape == (B, T, S, D)
    assert out.dtype == x.dtype
    # bf16 MXU inputs -> relaxed tolerance vs. the f32 reference.
    np.testing.assert_allclose(np.asarray(out), np.asarray(ref),
                               rtol=2e-2, atol=2e-2)

    print("KERNEL_OK")
</pallas_src>

<mosaic_0001>
module attributes {stable_mosaic.version = 11 : i64} {
  func.func @glu_kernel(%arg0: i32, %arg1: memref<256x128xf32, #tpu.memory_space<vmem>>, %arg2: memref<128x256xbf16, #tpu.memory_space<vmem>>, %arg3: memref<1x256xf32, #tpu.memory_space<vmem>>, %arg4: memref<256x128xf32, #tpu.memory_space<vmem>>) attributes {dimension_semantics = [#tpu.dimension_semantics<parallel>], iteration_bounds = array<i64: 2>, scalar_prefetch = 0 : i64, scratch_operands = 0 : i64, tpu.core_type = #tpu.core_type<tc>, window_params = [{transform_indices = @transform_0, window_bounds = array<i64: 256, 128>}, {pipeline_mode = #tpu.pipeline_mode<synchronous>, transform_indices = @transform_1, window_bounds = array<i64: 128, 256>}, {pipeline_mode = #tpu.pipeline_mode<synchronous>, transform_indices = @transform_2, window_bounds = array<i64: 1, 256>}, {transform_indices = @transform_3, window_bounds = array<i64: 256, 128>}]} {
    %c0 = arith.constant 0 : index
    %c0_0 = arith.constant 0 : index
    %0 = vector.load %arg1[%c0, %c0_0] : memref<256x128xf32, #tpu.memory_space<vmem>>, vector<256x128xf32>
    %1 = arith.truncf %0 : vector<256x128xf32> to vector<256x128xbf16>
    %c0_1 = arith.constant 0 : index
    %c0_2 = arith.constant 0 : index
    %2 = vector.load %arg2[%c0_1, %c0_2] : memref<128x256xbf16, #tpu.memory_space<vmem>>, vector<128x256xbf16>
    %cst = arith.constant dense<0.000000e+00> : vector<256x256xf32>
    %3 = tpu.matmul %1, %2, %cst {dimension_numbers = #tpu.dot_dimension_numbers<[1], [0], [0], [1], [0, 0, 1, 1], [], []>} : vector<256x128xbf16>, vector<128x256xbf16>, vector<256x256xf32> -> vector<256x256xf32>
    %c0_3 = arith.constant 0 : index
    %c0_4 = arith.constant 0 : index
    %4 = vector.load %arg3[%c0_3, %c0_4] : memref<1x256xf32, #tpu.memory_space<vmem>>, vector<1x256xf32>
    %5 = vector.broadcast %4 : vector<1x256xf32> to vector<256x256xf32>
    %6 = arith.addf %3, %5 : vector<256x256xf32>
    %7 = vector.extract_strided_slice %6 {offsets = [0, 0], sizes = [256, 128], strides = [1, 1]} : vector<256x256xf32> to vector<256x128xf32>
    %8 = vector.extract_strided_slice %6 {offsets = [0, 128], sizes = [256, 128], strides = [1, 1]} : vector<256x256xf32> to vector<256x128xf32>
    %cst_5 = arith.constant 0.000000e+00 : f32
    %9 = vector.broadcast %cst_5 : f32 to vector<256x128xf32>
    %10 = arith.subf %9, %7 : vector<256x128xf32>
    %11 = math.exp %10 : vector<256x128xf32>
    %cst_6 = arith.constant 1.000000e+00 : f32
    %12 = vector.broadcast %cst_6 : f32 to vector<256x128xf32>
    %13 = arith.addf %12, %11 : vector<256x128xf32>
    %14 = tpu.reciprocal %13 {approx = true} : vector<256x128xf32> -> vector<256x128xf32>
    %15 = arith.mulf %14, %8 : vector<256x128xf32>
    %c0_7 = arith.constant 0 : index
    %c0_8 = arith.constant 0 : index
    %16 = vector.load %arg4[%c0_7, %c0_8] : memref<256x128xf32, #tpu.memory_space<vmem>>, vector<256x128xf32>
    tpu.vector_store %arg4[%c0_7, %c0_8], %15 {strides = array<i32>} : memref<256x128xf32, #tpu.memory_space<vmem>>, vector<256x128xf32>,
    return
  }
  func.func @transform_0(%arg0: i32) -> (i32, i32) {
    %c0_i32 = arith.constant 0 : i32
    %c0_i32_0 = arith.constant 0 : i32
    return %arg0, %c0_i32 : i32, i32
  }
  func.func @transform_1(%arg0: i32) -> (i32, i32) {
    %c0_i32 = arith.constant 0 : i32
    %c0_i32_0 = arith.constant 0 : i32
    %c0_i32_1 = arith.constant 0 : i32
    return %c0_i32, %c0_i32_0 : i32, i32
  }
  func.func @transform_2(%arg0: i32) -> (i32, i32) {
    %c0_i32 = arith.constant 0 : i32
    %c0_i32_0 = arith.constant 0 : i32
    %c0_i32_1 = arith.constant 0 : i32
    return %c0_i32, %c0_i32_0 : i32, i32
  }
  func.func @transform_3(%arg0: i32) -> (i32, i32) {
    %c0_i32 = arith.constant 0 : i32
    %c0_i32_0 = arith.constant 0 : i32
    return %arg0, %c0_i32 : i32, i32
  }
}

module attributes {stable_mosaic.version = 11 : i64} {
  func.func @glu_kernel(%arg0: i32, %arg1: memref<256x128xf32, #tpu.memory_space<vmem>>, %arg2: memref<128x256xbf16, #tpu.memory_space<vmem>>, %arg3: memref<1x256xf32, #tpu.memory_space<vmem>>, %arg4: memref<256x128xf32, #tpu.memory_space<vmem>>) attributes {dimension_semantics = [#tpu.dimension_semantics<parallel>], iteration_bounds = array<i64: 2>, scalar_prefetch = 0 : i64, scratch_operands = 0 : i64, tpu.core_type = #tpu.core_type<tc>, window_params = [{transform_indices = @transform_0, window_bounds = array<i64: 256, 128>}, {pipeline_mode = #tpu.pipeline_mode<synchronous>, transform_indices = @transform_1, window_bounds = array<i64: 128, 256>}, {pipeline_mode = #tpu.pipeline_mode<synchronous>, transform_indices = @transform_2, window_bounds = array<i64: 1, 256>}, {transform_indices = @transform_3, window_bounds = array<i64: 256, 128>}]} {
    %c0 = arith.constant 0 : index
    %c0_0 = arith.constant 0 : index
    %0 = vector.load %arg1[%c0, %c0_0] : memref<256x128xf32, #tpu.memory_space<vmem>>, vector<256x128xf32>
    %1 = arith.truncf %0 : vector<256x128xf32> to vector<256x128xbf16>
    %c0_1 = arith.constant 0 : index
    %c0_2 = arith.constant 0 : index
    %2 = vector.load %arg2[%c0_1, %c0_2] : memref<128x256xbf16, #tpu.memory_space<vmem>>, vector<128x256xbf16>
    %cst = arith.constant dense<0.000000e+00> : vector<256x256xf32>
    %3 = tpu.matmul %1, %2, %cst {dimension_numbers = #tpu.dot_dimension_numbers<[1], [0], [0], [1], [0, 0, 1, 1], [], []>} : vector<256x128xbf16>, vector<128x256xbf16>, vector<256x256xf32> -> vector<256x256xf32>
    %c0_3 = arith.constant 0 : index
    %c0_4 = arith.constant 0 : index
    %4 = vector.load %arg3[%c0_3, %c0_4] : memref<1x256xf32, #tpu.memory_space<vmem>>, vector<1x256xf32>
    %5 = vector.broadcast %4 : vector<1x256xf32> to vector<256x256xf32>
    %6 = arith.addf %3, %5 : vector<256x256xf32>
    %7 = vector.extract_strided_slice %6 {offsets = [0, 0], sizes = [256, 128], strides = [1, 1]} : vector<256x256xf32> to vector<256x128xf32>
    %8 = vector.extract_strided_slice %6 {offsets = [0, 128], sizes = [256, 128], strides = [1, 1]} : vector<256x256xf32> to vector<256x128xf32>
    %cst_5 = arith.constant 0.000000e+00 : f32
    %9 = vector.broadcast %cst_5 : f32 to vector<256x128xf32>
    %10 = arith.subf %9, %7 : vector<256x128xf32>
    %11 = math.exp %10 : vector<256x128xf32>
    %cst_6 = arith.constant 1.000000e+00 : f32
    %12 = vector.broadcast %cst_6 : f32 to vector<256x128xf32>
    %13 = arith.addf %12, %11 : vector<256x128xf32>
    %14 = tpu.reciprocal %13 {approx = true} : vector<256x128xf32> -> vector<256x128xf32>
    %15 = arith.mulf %14, %8 : vector<256x128xf32>
    %c0_7 = arith.constant 0 : index
    %c0_8 = arith.constant 0 : index
    %16 = vector.load %arg4[%c0_7, %c0_8] : memref<256x128xf32, #tpu.memory_space<vmem>>, vector<256x128xf32>
    tpu.vector_store %arg4[%c0_7, %c0_8], %15 {strides = array<i32>} : memref<256x128xf32, #tpu.memory_space<vmem>>, vector<256x128xf32>,
    return
  }
  func.func @transform_0(%arg0: i32) -> (i32, i32) {
    %c0_i32 = arith.constant 0 : i32
    %c0_i32_0 = arith.constant 0 : i32
    return %arg0, %c0_i32 : i32, i32
  }
  func.func @transform_1(%arg0: i32) -> (i32, i32) {
    %c0_i32 = arith.constant 0 : i32
    %c0_i32_0 = arith.constant 0 : i32
    %c0_i32_1 = arith.constant 0 : i32
    return %c0_i32, %c0_i32_0 : i32, i32
  }
  func.func @transform_2(%arg0: i32) -> (i32, i32) {
    %c0_i32 = arith.constant 0 : i32
    %c0_i32_0 = arith.constant 0 : i32
    %c0_i32_1 = arith.constant 0 : i32
    return %c0_i32, %c0_i32_0 : i32, i32
  }
  func.func @transform_3(%arg0: i32) -> (i32, i32) {
    %c0_i32 = arith.constant 0 : i32
    %c0_i32_0 = arith.constant 0 : i32
    return %arg0, %c0_i32 : i32, i32
  }
}

</mosaic_0001>

<bundles_post_ra>
// kernel: tpu_custom_call.1
= control target key start
LH: loop header
LB: loop body
LE: loop exit
PB: predicated region body
PF: predicated region fallthrough
CT: control target
= control target key end

     0   :  { %8 = vsyncpa [#allocation3], 0  ;;  %s1734_s0 = inlined_call_operand.hbm [shape: f32[512,128], index: 0, kind: input, shape index: {}]   ;;  %s1735_s1 = inlined_call_operand.hbm [shape: bf16[128,256], index: 1, kind: input, shape index: {}]   ;;  %s1736_s2 = inlined_call_operand.vmem [shape: f32[1,256], index: 2, kind: input, shape index: {}]   ;;  %s1737_s3 = inlined_call_operand.hbm [shape: f32[512,128], index: 3, kind: output, shape index: {}]  }
   0x1   :  { %10 = vsyncpa [#allocation3 + $0x1], 0 }
   0x2   :  { %11 = vsyncpa [#allocation6], 0 }
   0x3   :  { %12 = vsyncpa [#allocation4], 0 }
   0x4   :  { %14 = vsyncpa [#allocation4 + $0x1], 0  ;;  %s1293_s12 = smov 0   ;;  %s1295_s13 = smov 0  }
   0x5   :  { %s1297_s14 = smov 0   ;;  %s1299_s15 = smov 0  }
   0x6 LB: > { %s1314_s16 = sadd.s32 4294967295, %s1263_s15   ;;  %s877_s17 = sadd.s32 4294967294, %s1263_s15   ;;  %s1263_s15 = sphi %s1299_s15, %s1759_s15   ;;  %s1259_s14 = sphi %s1297_s14, %s1758_s14   ;;  %s1255_s13 = sphi %s1295_s13, %s1757_s13   ;;  %s1251_s12 = sphi %s1293_s12, %s1756_s12  }
   0x7   : > { %p40_p0 = scmp.ne.s32.totalorder %s1255_s13, %s1251_s12  ;;  %p1738_p1 = scmp.eq.s32.totalorder %s1314_s16, 0 }
   0x8   : > { %p112_p3 = scmp.eq.s32.totalorder %s877_s17, 1  ;;  %p878_p5 = scmp.ge.s32.totalorder %s1263_s15, 1 }
   0x9   : > { %p1323_p4 = por %p1738_p1, %p40_p0  ;;  %p119_p7 = scmp.lt.s32.totalorder %s1263_s15, 3 }
   0xa   : > { %p1328_p6 = por %p112_p3, %p40_p0  ;;  %s1265_s21 = smov [#allocation5]  }
   0xb   : > { %s1742_s18 = scalar_select %p1323_p4, 1, 0 }
   0xc   : > { %s1743_s19 = scalar_select %p1328_p6, 1, 0 }
   0xd   : > { %p1333_p8 = pnand %p878_p5, %p119_p7  ;;  %s131_s22 = sshll.u32 %s1265_s21, 4  ;;  %s132_s22 = int_to_ptr.vmem [resolvable:$true] %s131_s22 }
   0xe   : > { %s1347_s24 = sadd.s32 1, %s1263_s15   ;;  %s27_s25 = sadd.s32 1, %s1259_s14 }
   0xf   : > { %s1744_s20 = scalar_select %p1333_p8, 1, 0 }
  0x10   : > { %p935_p9 = pneg %p1333_p8  ;;  %s24_s26 = ssub.s32 %s1263_s15, %s1347_s24 }
  0x11   : > { %s1152_s27 = scalar_lea.vmem %s132_s22, 2048  ;;  %p1160_p5 = scmp.lt.s32.totalorder %s132_s22, %s132_s22 }
  0x12   : > { %p1342_p11 = pnand %p935_p9, %p1738_p1  ;;  %p1153_p13 = scmp.ne.s32.totalorder %s132_s22, %s1152_s27 }
  0x13   : > { %p1161_p7 = scmp.lt.s32.totalorder %s1152_s27, %s1152_s27 }
  0x14   : > { %p1143_p12 = pneg %p1342_p11 }
  0x15   : > { %p1162_p10 = por %p1161_p7, %p1160_p5 }
  0x16   : > { %p1155_p0 = pnand %p1153_p13, %p1143_p12 }
  0x18   : > { %p1156_p3 = pneg %p1155_p0 }
  0x1a   : > { %p1163_p2 = pnand %p1162_p10, %p1156_p3 }
  0x1c   : > { %1166 = shalt.err (!%p1163_p2)
}
  0x1d   : > { %s1266_s28 = smov 128   ;;  %s1267_s29 = smov 8  }
  0x1e   : > { %938 = dma.hbm_to_vmem [thread:$0]  (!%p1342_p11), %s1735_s1, 2048, %s132_s22, [#allocation6], %s1266_s28, %s1266_s28, %s1267_s29  }
  0x1f   : > { %p25_p2 = scmp.eq.s32.totalorder %s24_s26, 0  ;;  %p34_p9 = scmp.ne.s32.totalorder %s1259_s14, %s1255_s13 }
  0x20   : > { %p35_p10 = scmp.eq.s32.totalorder %s1263_s15, 0  ;;  %p948_p12 = scmp.lt.s32.totalorder %s1263_s15, 2 }
  0x21   : > { %s1367_s5 = scalar_select %p25_p2, %s1259_s14, %s27_s25  }
  0x22   : > { %p36_p13 = por %p35_p10, %p34_p9  ;;  %p1746_p0 = scmp.eq.s32.totalorder %s1314_s16, 1 }
  0x23   : > { %s148_s7 = sand.u32 1, %s1259_s14   ;;  %s909_s8 = sshll.u32 %s1263_s15, 12 }
  0x24   : > { %p1371_p3 = por %p1746_p0, %p34_p9  ;;  %s881_s9 = sshll.u32 %s148_s7, 8 }
  0x25   : > { %s1380_s17 = scalar_lea.hbm %s1734_s0, %s909_s8  ;;  %s152_s21 = scalar_lea.vmem [#allocation2], %s881_s9 }
  0x26   : > { %s1747_s6 = scalar_select %p1371_p3, 1, 0 }
  0x27   : > { %s159_s22 = sshll.u32 %s152_s21, 4  ;;  %p1382_p11 = pnand %p948_p12, %p36_p13  ;;  %s1386_s22 = int_to_ptr.vmem [resolvable:$true] %s159_s22 }
  0x28   : > { %s1388_s25 = scalar_lea.sflag [#allocation3], %s148_s7  ;;  %s1167_s26 = scalar_lea.hbm %s1380_s17, 4096 }
  0x29   : > { %p1168_p5 = scmp.ne.s32.totalorder %s1380_s17, %s1167_s26  ;;  %p1169_p7 = pneg %p1382_p11 }
  0x2a   : > { %s1172_s4 = scalar_lea.hbm %s1734_s0, 8192  ;;  %p1173_p10 = scmp.lt.s32.totalorder %s1380_s17, %s1734_s0 }
  0x2b   : > { %p1170_p2 = pnand %p1169_p7, %p1168_p5  ;;  %p1174_p12 = scmp.lt.s32.totalorder %s1172_s4, %s1167_s26 }
  0x2d   : > { %p1171_p9 = pneg %p1170_p2  ;;  %p1175_p13 = por %p1174_p12, %p1173_p10 }
  0x2f   : > { %p1176_p0 = pnand %p1175_p13, %p1171_p9 }
  0x31   : > { %1179 = shalt.err (!%p1176_p0)
}
  0x32   : > { %s1180_s7 = scalar_lea.vmem %s1386_s22, 4096  ;;  %s1268_s10 = smov [#allocation2]  }
  0x33   : > { %p1181_p1 = scmp.ne.s32.totalorder %s1386_s22, %s1180_s7  ;;  %s1185_s11 = sshll.u32 %s1268_s10, 4  ;;  %s1186_s11 = int_to_ptr.vmem [resolvable:$false] %s1185_s11 }
  0x34   : > { %s1187_s21 = scalar_lea.vmem %s1186_s11, 8192  ;;  %p1188_p2 = scmp.lt.s32.totalorder %s1386_s22, %s1186_s11 }
  0x35   : > { %p1183_p6 = pnand %p1181_p1, %p1169_p7  ;;  %p1189_p3 = scmp.lt.s32.totalorder %s1187_s21, %s1180_s7 }
  0x37   : > { %p1184_p5 = pneg %p1183_p6  ;;  %p1190_p4 = por %p1189_p3, %p1188_p2 }
  0x39   : > { %p1191_p8 = pnand %p1190_p4, %p1184_p5 }
  0x3b   : > { %1194 = shalt.err (!%p1191_p8)
}
  0x3c   : > { %942 = dma.hbm_to_vmem [thread:$0]  (!%p1382_p11), %s1380_s17, 4096, %s1386_s22, %s1388_s25, %s1266_s28, %s1266_s28, %s1267_s29  }
  0x3d   : > { %p1749_p1 = scmp.ne.s32.totalorder %s1744_s20, 0 }
  0x3e   : > { %s1415_s26 = sand.u32 (!%p1749_p1), 1, %s1255_s13   ;;  %p1750_p4 = scmp.ne.s32.totalorder (!%p1749_p1), %s1742_s18, 0 }
  0x3f   : > { %171 = sbr.rel (%p1749_p1) target bundleno = 414 (0x19e), region = 32  ;;  %s885_s27 = sshll.u32 (!%p1749_p1), %s1415_s26, 8 }
  0x40   : > { %s174_s30 = scalar_lea.sflag (!%p1749_p1), [#allocation3], %s1415_s26  ;;  %s1421_s23 = scalar_lea.vmem (!%p1749_p1), [#allocation2], %s885_s27 }
  0x44   : > { %1238 = dma.done.wait (%p1750_p4), %s174_s30, 4096  }
  0x45   : > { %1240 = vsyncadd (%p1750_p4), %s174_s30, 4294963200  ;;  %p1751_p6 = scmp.eq.s32.totalorder %s1314_s16, 0 }
  0x47   : > { %1242 = dma.done.wait (%p1751_p6), [#allocation6], 2048   ;;  %p1752_p8 = pmov %p1751_p6 }
  0x48   : > { %v1269_v0 = vmov 0   ;;  %v989_v1 = vld [vmem:[#allocation5 + $0x74] ss:$8 sps:$4 sm:$0xff]   ;;  %v991_v2 = vld [vmem:[#allocation5 + $0x70] ss:$8 sps:$4 sm:$0xff]   ;;  %v207_v17 = vld [vmem:[%s1421_s23] sm:$0xff] }
  0x49   : > { %1244 = vsyncadd (%p1752_p8), [#allocation6], 4294965248  ;;  %395 = vmatprep.mubr.bf16.mxu0 %v1269_v0  ;;  %475 = vmatprep.mubr.bf16.mxu1 %v1269_v0  ;;  %v992_v3 = vld [vmem:[#allocation5 + $0x64] ss:$8 sps:$4 sm:$0xff]   ;;  %v994_v4 = vld [vmem:[#allocation5 + $0x60] ss:$8 sps:$4 sm:$0xff]  }
  0x4a   : > { %363 = vmatprep.subr.bf16.mxu0 %v989_v1  ;;  %911 = vmatprep.subr.bf16.mxu1 %v989_v1  ;;  %v995_v5 = vld [vmem:[#allocation5 + $0x54] ss:$8 sps:$4 sm:$0xff]   ;;  %v997_v6 = vld [vmem:[#allocation5 + $0x50] ss:$8 sps:$4 sm:$0xff]   ;;  %v998_v7 = vld [vmem:[#allocation5 + $0x44] ss:$8 sps:$4 sm:$0xff]  }
  0x4b   : > { %364 = vmatpush1.bf16.msra.mxu0 %v991_v2  ;;  %919 = vmatpush1.bf16.msra.mxu1 %v991_v2  ;;  %v1000_v8 = vld [vmem:[#allocation5 + $0x40] ss:$8 sps:$4 sm:$0xff]   ;;  %v1001_v9 = vld [vmem:[#allocation5 + $0x34] ss:$8 sps:$4 sm:$0xff]   ;;  %v1003_v10 = vld [vmem:[#allocation5 + $0x30] ss:$8 sps:$4 sm:$0xff]   ;;  %v273_v2 = vlaneseq }
  0x4c   : > { %365 = vmatprep.subr.bf16.mxu0 %v992_v3  ;;  %912 = vmatprep.subr.bf16.mxu1 %v992_v3  ;;  %v1004_v11 = vld [vmem:[#allocation5 + $0x24] ss:$8 sps:$4 sm:$0xff]   ;;  %v1006_v12 = vld [vmem:[#allocation5 + $0x20] ss:$8 sps:$4 sm:$0xff]   ;;  %v1007_v13 = vld [vmem:[#allocation5 + $0x14] ss:$8 sps:$4 sm:$0xff]  }
  0x4d   : > { %v1009_v14 = vld [vmem:[#allocation5 + $0x10] ss:$8 sps:$4 sm:$0xff]   ;;  %v1010_v15 = vld [vmem:[#allocation5 + $0x4] ss:$8 sps:$4 sm:$0xff]   ;;  %v1012_v16 = vld [vmem:[#allocation5] ss:$8 sps:$4 sm:$0xff]  }
  0x4e   : > { %v208_v18 = vld [vmem:[%s1421_s23 + $0x8] sm:$0xff]  ;;  %v223_v19 = vld [vmem:[%s1421_s23 + $0x80] sm:$0xff]  ;;  %v209_v23 = vld [vmem:[%s1421_s23 + $0x10] sm:$0xff]  ;;  %v1479_v3 = vshrl.u32 %v273_v2, 7  ;;  %s1560_s28 = scalar_lea.vmem [#allocation7], %s885_s27  ;;  %s910_s29 = sshll.u32 %s1314_s16, 12 }
  0x4f   : > { %366 = vmatpush1.bf16.msra.mxu0 %v994_v4  ;;  %920 = vmatpush1.bf16.msra.mxu1 %v994_v4  ;;  %v224_v20 = vld [vmem:[%s1421_s23 + $0x88] sm:$0xff]  ;;  %v239_v21 = vpack.c.bf16 %v208_v18, %v207_v17  ;;  %v210_v24 = vld [vmem:[%s1421_s23 + $0x18] sm:$0xff]  ;;  %v225_v25 = vld [vmem:[%s1421_s23 + $0x90] sm:$0xff]  ;;  %s794_s17 = sshll.u32 %s1560_s28, 4  ;;  %s1687_s4 = scalar_lea.hbm %s1737_s3, %s910_s29  ;;  %s1689_s17 = int_to_ptr.vmem [resolvable:$true] %s794_s17 }
  0x50   : > { %367 = vmatprep.subr.bf16.mxu0 %v995_v5  ;;  %913 = vmatprep.subr.bf16.mxu1 %v995_v5  ;;  %v247_v22 = vpack.c.bf16 %v224_v20, %v223_v19  ;;  %v226_v26 = vld [vmem:[%s1421_s23 + $0x98] sm:$0xff]  ;;  %v240_v27 = vpack.c.bf16 %v210_v24, %v209_v23  ;;  %v211_v29 = vld [vmem:[%s1421_s23 + $0x20] sm:$0xff]  ;;  %v212_v30 = vld [vmem:[%s1421_s23 + $0x28] sm:$0xff]  ;;  %v275_v4 = vsub.s32 0, %v1479_v3  ;;  %s781_s16 = scalar_lea.sflag [#allocation4], %s1415_s26  ;;  %s1195_s8 = scalar_lea.vmem %s1689_s17, 4096 }
  0x51   : > { %v248_v28 = vpack.c.bf16 %v226_v26, %v225_v25  ;;  %v227_v31 = vld [vmem:[%s1421_s23 + $0xa0] sm:$0xff]  ;;  %v228_v32 = vld [vmem:[%s1421_s23 + $0xa8] sm:$0xff]  ;;  %v241_v33 = vpack.c.bf16 %v212_v30, %v211_v29  ;;  %v213_v35 = vld [vmem:[%s1421_s23 + $0x30] sm:$0xff]  ;;  %p1196_p3 = scmp.ne.s32.totalorder %s1689_s17, %s1195_s8  ;;  %p1753_p11 = scmp.ne.s32.totalorder %s1747_s6, 0 }
  0x52   : > { %v249_v34 = vpack.c.bf16 %v228_v32, %v227_v31  ;;  %v214_v36 = vld [vmem:[%s1421_s23 + $0x38] sm:$0xff]  ;;  %v229_v37 = vld [vmem:[%s1421_s23 + $0xb0] sm:$0xff]  ;;  %v215_v41 = vld [vmem:[%s1421_s23 + $0x40] sm:$0xff]  ;;  %s1270_s9 = smov [#allocation7]  }
  0x53   : > { %368 = vmatpush1.bf16.msra.mxu0 %v997_v6  ;;  %921 = vmatpush1.bf16.msra.mxu1 %v997_v6  ;;  %v230_v38 = vld [vmem:[%s1421_s23 + $0xb8] sm:$0xff]  ;;  %v242_v39 = vpack.c.bf16 %v214_v36, %v213_v35  ;;  %v216_v42 = vld [vmem:[%s1421_s23 + $0x48] sm:$0xff]  ;;  %v231_v43 = vld [vmem:[%s1421_s23 + $0xc0] sm:$0xff]  ;;  %p1197_p7 = pnand %p1196_p3, %p1753_p11  ;;  %s1199_s7 = sshll.u32 %s1270_s9, 4  ;;  %s1200_s7 = int_to_ptr.vmem [resolvable:$false] %s1199_s7 }
  0x54   : > { %369 = vmatprep.subr.bf16.mxu0 %v998_v7  ;;  %914 = vmatprep.subr.bf16.mxu1 %v998_v7  ;;  %v250_v40 = vpack.c.bf16 %v230_v38, %v229_v37  ;;  %v232_v44 = vld [vmem:[%s1421_s23 + $0xc8] sm:$0xff]  ;;  %v243_v45 = vpack.c.bf16 %v216_v42, %v215_v41  ;;  %v217_v47 = vld [vmem:[%s1421_s23 + $0x50] sm:$0xff]  ;;  %v218_v48 = vld [vmem:[%s1421_s23 + $0x58] sm:$0xff]  ;;  %s1201_s10 = scalar_lea.vmem %s1200_s7, 8192  ;;  %p1202_p10 = scmp.lt.s32.totalorder %s1689_s17, %s1200_s7 }
  0x55   : > { %v251_v46 = vpack.c.bf16 %v232_v44, %v231_v43  ;;  %v233_v49 = vld [vmem:[%s1421_s23 + $0xd0] sm:$0xff]  ;;  %v234_v50 = vld [vmem:[%s1421_s23 + $0xd8] sm:$0xff]  ;;  %v244_v51 = vpack.c.bf16 %v218_v48, %v217_v47  ;;  %v219_v53 = vld [vmem:[%s1421_s23 + $0x60] sm:$0xff]  ;;  %p1198_p9 = pneg %p1197_p7  ;;  %p1203_p12 = scmp.lt.s32.totalorder %s1201_s10, %s1195_s8 }
  0x56   : > { %v252_v52 = vpack.c.bf16 %v234_v50, %v233_v49  ;;  %v220_v54 = vld [vmem:[%s1421_s23 + $0x68] sm:$0xff]  ;;  %v235_v55 = vld [vmem:[%s1421_s23 + $0xe0] sm:$0xff]  ;;  %v221_v59 = vld [vmem:[%s1421_s23 + $0x70] sm:$0xff] }
  0x57   : > { %370 = vmatpush1.bf16.msra.mxu0 %v1000_v8  ;;  %922 = vmatpush1.bf16.msra.mxu1 %v1000_v8  ;;  %v236_v56 = vld [vmem:[%s1421_s23 + $0xe8] sm:$0xff]  ;;  %v245_v57 = vpack.c.bf16 %v220_v54, %v219_v53  ;;  %v222_v60 = vld [vmem:[%s1421_s23 + $0x78] sm:$0xff]  ;;  %v237_v61 = vld [vmem:[%s1421_s23 + $0xf0] sm:$0xff]  ;;  %p1204_p13 = por %p1203_p12, %p1202_p10 }
  0x58   : > { %371 = vmatprep.subr.bf16.mxu0 %v1001_v9  ;;  %915 = vmatprep.subr.bf16.mxu1 %v1001_v9  ;;  %v253_v58 = vpack.c.bf16 %v236_v56, %v235_v55  ;;  %v238_v62 = vld [vmem:[%s1421_s23 + $0xf8] sm:$0xff]  ;;  %v246_v63 = vpack.c.bf16 %v222_v60, %v221_v59  ;;  %v1485_v5 = vld [vmem:[%s1736_s2] sm:$0x3] }
  0x59   : > { %v254_v1 = vpack.c.bf16 %v238_v62, %v237_v61  ;;  %v1488_v6 = vrot.slane %v1485_v5, %v275_v4  ;;  %p1205_p0 = pnand %p1204_p13, %p1198_p9 }
  0x5b   : > { %372 = vmatpush1.bf16.msra.mxu0 %v1003_v10  ;;  %923 = vmatpush1.bf16.msra.mxu1 %v1003_v10 }
  0x5c   : > { %373 = vmatprep.subr.bf16.mxu0 %v1004_v11  ;;  %916 = vmatprep.subr.bf16.mxu1 %v1004_v11 }
  0x5f   : > { %374 = vmatpush1.bf16.msra.mxu0 %v1006_v12  ;;  %924 = vmatpush1.bf16.msra.mxu1 %v1006_v12 }
  0x60   : > { %375 = vmatprep.subr.bf16.mxu0 %v1007_v13  ;;  %917 = vmatprep.subr.bf16.mxu1 %v1007_v13 }
  0x63   : > { %376 = vmatpush1.bf16.msra.mxu0 %v1009_v14  ;;  %925 = vmatpush1.bf16.msra.mxu1 %v1009_v14 }
  0x64   : > { %377 = vmatprep.subr.bf16.mxu0 %v1010_v15  ;;  %918 = vmatprep.subr.bf16.mxu1 %v1010_v15 }
  0x67   : > { %378 = vmatpush1.bf16.msra.mxu0 %v1012_v16  ;;  %926 = vmatpush1.bf16.msra.mxu1 %v1012_v16 }
  0x6a   : > { %396 = vmatmul.mubr.bf16.vlgmr.msra.gmra.mxu0 %v239_v21  ;;  %476 = vmatmul.mubr.bf16.vlgmr.msra.gmra.mxu1 %v247_v22 }
  0x6b   : > { %405 = vmatprep.mubr.bf16.mxu0 %v1269_v0  ;;  %485 = vmatprep.mubr.bf16.mxu1 %v1269_v0 }
  0x72   : > { %406 = vmatmul.mubr.bf16.gmra.mxu0 %v240_v27  ;;  %486 = vmatmul.mubr.bf16.gmra.mxu1 %v248_v28 }
  0x73   : > { %415 = vmatprep.mubr.bf16.mxu0 %v1269_v0  ;;  %495 = vmatprep.mubr.bf16.mxu1 %v1269_v0 }
  0x7a   : > { %416 = vmatmul.mubr.bf16.gmra.mxu0 %v241_v33  ;;  %496 = vmatmul.mubr.bf16.gmra.mxu1 %v249_v34 }
  0x7b   : > { %425 = vmatprep.mubr.bf16.mxu0 %v1269_v0  ;;  %505 = vmatprep.mubr.bf16.mxu1 %v1269_v0 }
  0x82   : > { %426 = vmatmul.mubr.bf16.gmra.mxu0 %v242_v39  ;;  %506 = vmatmul.mubr.bf16.gmra.mxu1 %v250_v40 }
  0x83   : > { %435 = vmatprep.mubr.bf16.mxu0 %v1269_v0  ;;  %515 = vmatprep.mubr.bf16.mxu1 %v1269_v0 }
  0x8a   : > { %436 = vmatmul.mubr.bf16.gmra.mxu0 %v243_v45  ;;  %516 = vmatmul.mubr.bf16.gmra.mxu1 %v251_v46 }
  0x8b   : > { %445 = vmatprep.mubr.bf16.mxu0 %v1269_v0  ;;  %525 = vmatprep.mubr.bf16.mxu1 %v1269_v0 }
  0x92   : > { %446 = vmatmul.mubr.bf16.gmra.mxu0 %v244_v51  ;;  %526 = vmatmul.mubr.bf16.gmra.mxu1 %v252_v52 }
  0x93   : > { %455 = vmatprep.mubr.bf16.mxu0 %v1269_v0  ;;  %535 = vmatprep.mubr.bf16.mxu1 %v1269_v0 }
  0x9a   : > { %456 = vmatmul.mubr.bf16.gmra.mxu0 %v245_v57  ;;  %536 = vmatmul.mubr.bf16.gmra.mxu1 %v253_v58 }
  0x9b   : > { %465 = vmatprep.mubr.bf16.mxu0 %v1269_v0  ;;  %545 = vmatprep.mubr.bf16.mxu1 %v1269_v0 }
  0xa2   : > { %466 = vmatmul.mubr.bf16.gmra.mxu0 %v246_v63  ;;  %546 = vmatmul.mubr.bf16.gmra.mxu1 %v254_v1 }
 0x12a   : > { %v397_v0 = vpop.f32.mrf.mxu0  ;;  %v477_v7 = vpop.f32.mrf.mxu1 }
 0x12b   : > { %v398_v8 = vadd.f32 %v397_v0, %v1488_v6  ;;  %v478_v9 = vadd.f32 %v477_v7, %v1488_v6 }
 0x12c   : > { %v1492_v10 = vpop.f32.mrf.mxu0  ;;  %v1494_v11 = vpop.f32.mrf.mxu1 }
 0x12d   : > { %v556_v12 = vsub.f32 0.0, %v398_v8  ;;  %v572_v13 = vsub.f32 0.0, %v478_v9 }
 0x12e   : > { %v401_v14 = vpop.f32.mrf.mxu0  ;;  %v481_v15 = vpop.f32.mrf.mxu1 }
 0x12f   : > { %v588_v16 = vmul.f32 1.442695, %v556_v12  ;;  %v620_v17 = vmul.f32 1.442695, %v572_v13  ;;  %v402_v18 = vadd.f32 %v401_v14, %v1488_v6  ;;  %v482_v19 = vadd.f32 %v481_v15, %v1488_v6 }
 0x130   : > { %v1498_v20 = vpop.f32.mrf.mxu0  ;;  %v1500_v21 = vpop.f32.mrf.mxu1 }
 0x131   : > { %1013 = vpow2.f32 %v588_v16  ;;  %v557_v22 = vsub.f32 0.0, %v402_v18  ;;  %v573_v23 = vsub.f32 0.0, %v482_v19 }
 0x132   : > { %1015 = vpow2.f32 %v620_v17  ;;  %v407_v24 = vpop.f32.mrf.mxu0  ;;  %v487_v25 = vpop.f32.mrf.mxu1 }
 0x133   : > { %v590_v26 = vmul.f32 1.442695, %v557_v22  ;;  %v622_v27 = vmul.f32 1.442695, %v573_v23  ;;  %v408_v28 = vadd.f32 %v407_v24, %v1488_v6  ;;  %v488_v29 = vadd.f32 %v487_v25, %v1488_v6 }
 0x134   : > { %v1504_v30 = vpop.f32.mrf.mxu0  ;;  %v1506_v31 = vpop.f32.mrf.mxu1  ;;  %v279_v23 = vsub.s32 1, %v1479_v3 }
 0x135   : > { %1017 = vpow2.f32 %v590_v26  ;;  %v558_v32 = vsub.f32 0.0, %v408_v28  ;;  %v574_v33 = vsub.f32 0.0, %v488_v29 }
 0x136   : > { %1019 = vpow2.f32 %v622_v27  ;;  %v411_v34 = vpop.f32.mrf.mxu0  ;;  %v491_v35 = vpop.f32.mrf.mxu1 }
 0x137   : > { %v592_v36 = vmul.f32 1.442695, %v558_v32  ;;  %v624_v37 = vmul.f32 1.442695, %v574_v33  ;;  %v412_v38 = vadd.f32 %v411_v34, %v1488_v6  ;;  %v492_v39 = vadd.f32 %v491_v35, %v1488_v6 }
 0x138   : > { %v1510_v40 = vpop.f32.mrf.mxu0  ;;  %v1512_v41 = vpop.f32.mrf.mxu1 }
 0x139   : > { %1021 = vpow2.f32 %v592_v36  ;;  %v559_v42 = vsub.f32 0.0, %v412_v38  ;;  %v575_v43 = vsub.f32 0.0, %v492_v39  ;;  %v1540_v39 = vrot.slane %v1485_v5, %v279_v23 }
 0x13a   : > { %1023 = vpow2.f32 %v624_v37  ;;  %v417_v44 = vpop.f32.mrf.mxu0  ;;  %v497_v45 = vpop.f32.mrf.mxu1 }
 0x13b   : > { %v594_v46 = vmul.f32 1.442695, %v559_v42  ;;  %v626_v47 = vmul.f32 1.442695, %v575_v43  ;;  %v418_v48 = vadd.f32 %v417_v44, %v1488_v6  ;;  %v498_v49 = vadd.f32 %v497_v45, %v1488_v6 }
 0x13c   : > { %v1516_v50 = vpop.f32.mrf.mxu0  ;;  %v1518_v51 = vpop.f32.mrf.mxu1 }
 0x13d   : > { %1025 = vpow2.f32 %v594_v46  ;;  %v560_v52 = vsub.f32 0.0, %v418_v48  ;;  %v576_v53 = vsub.f32 0.0, %v498_v49 }
 0x13e   : > { %v1014_v54 = vpop.eup %1013  ;;  %1027 = vpow2.f32 %v626_v47  ;;  %v421_v55 = vpop.f32.mrf.mxu0 }
 0x13f   : > { %v501_v56 = vpop.f32.mrf.mxu1  ;;  %v1016_v57 = vpop.eup %1015  ;;  %v652_v58 = vadd.f32 1.0, %v1014_v54  ;;  %v596_v59 = vmul.f32 1.442695, %v560_v52  ;;  %v422_v60 = vadd.f32 %v421_v55, %v1488_v6  ;;  %v628_v62 = vmul.f32 1.442695, %v576_v53 }
 0x140   : > { %v668_v61 = vadd.f32 1.0, %v1016_v57  ;;  %v502_v63 = vadd.f32 %v501_v56, %v1488_v6  ;;  %v1522_v1 = vpop.f32.mrf.mxu0  ;;  %v400_v57 = vadd.f32 %v1492_v10, %v1540_v39 }
 0x141   : > { %v1524_v2 = vpop.f32.mrf.mxu1  ;;  %1029 = vrcp.f32 %v652_v58  ;;  %v561_v4 = vsub.f32 0.0, %v422_v60  ;;  %v480_v60 = vadd.f32 %v1494_v11, %v1540_v39 }
 0x142   : > { %v1018_v0 = vpop.eup %1017  ;;  %1031 = vrcp.f32 %v668_v61  ;;  %v577_v7 = vsub.f32 0.0, %v502_v63  ;;  %v427_v8 = vpop.f32.mrf.mxu0 }
 0x143   : > { %v507_v9 = vpop.f32.mrf.mxu1  ;;  %v1020_v12 = vpop.eup %1019  ;;  %v653_v13 = vadd.f32 1.0, %v1018_v0  ;;  %1033 = vpow2.f32 %v596_v59  ;;  %v598_v14 = vmul.f32 1.442695, %v561_v4  ;;  %v428_v15 = vadd.f32 %v427_v8, %v1488_v6 }
 0x144   : > { %v669_v16 = vadd.f32 1.0, %v1020_v12  ;;  %1035 = vpow2.f32 %v628_v62  ;;  %v630_v17 = vmul.f32 1.442695, %v577_v7  ;;  %v508_v18 = vadd.f32 %v507_v9, %v1488_v6  ;;  %v1528_v19 = vpop.f32.mrf.mxu0 }
 0x145   : > { %v1530_v22 = vpop.f32.mrf.mxu1  ;;  %1037 = vrcp.f32 %v653_v13  ;;  %v562_v24 = vsub.f32 0.0, %v428_v15 }
 0x146   : > { %v1022_v25 = vpop.eup %1021  ;;  %1039 = vrcp.f32 %v669_v16  ;;  %v578_v26 = vsub.f32 0.0, %v508_v18  ;;  %v431_v27 = vpop.f32.mrf.mxu0  ;;  %v404_v16 = vadd.f32 %v1498_v20, %v1540_v39 }
 0x147   : > { %v511_v28 = vpop.f32.mrf.mxu1  ;;  %v1024_v29 = vpop.eup %1023  ;;  %v654_v32 = vadd.f32 1.0, %v1022_v25  ;;  %1041 = vpow2.f32 %v598_v14  ;;  %v600_v33 = vmul.f32 1.442695, %v562_v24  ;;  %v432_v34 = vadd.f32 %v431_v27, %v1488_v6 }
 0x148   : > { %v670_v35 = vadd.f32 1.0, %v1024_v29  ;;  %1043 = vpow2.f32 %v630_v17  ;;  %v632_v36 = vmul.f32 1.442695, %v578_v26  ;;  %v512_v37 = vadd.f32 %v511_v28, %v1488_v6  ;;  %v1535_v38 = vpop.f32.mrf.mxu0 }
 0x149   : > { %v1537_v3 = vpop.f32.mrf.mxu1  ;;  %1045 = vrcp.f32 %v654_v32  ;;  %v563_v42 = vsub.f32 0.0, %v432_v34  ;;  %v484_v24 = vadd.f32 %v1500_v21, %v1540_v39 }
 0x14a   : > { %v1026_v43 = vpop.eup %1025  ;;  %1047 = vrcp.f32 %v670_v35  ;;  %v579_v44 = vsub.f32 0.0, %v512_v37  ;;  %v437_v45 = vpop.f32.mrf.mxu0 }
 0x14b   : > { %v517_v46 = vpop.f32.mrf.mxu1  ;;  %v1028_v47 = vpop.eup %1027  ;;  %v655_v48 = vadd.f32 1.0, %v1026_v43  ;;  %1049 = vpow2.f32 %v600_v33  ;;  %v602_v49 = vmul.f32 1.442695, %v563_v42  ;;  %v438_v52 = vadd.f32 %v437_v45, %v1488_v6 }
 0x14c   : > { %v671_v53 = vadd.f32 1.0, %v1028_v47  ;;  %1051 = vpow2.f32 %v632_v36  ;;  %v634_v54 = vmul.f32 1.442695, %v579_v44  ;;  %v518_v55 = vadd.f32 %v517_v46, %v1488_v6  ;;  %v1544_v5 = vpop.f32.mrf.mxu0 }
 0x14d   : > { %v1546_v56 = vpop.f32.mrf.mxu1  ;;  %1053 = vrcp.f32 %v655_v48  ;;  %v564_v58 = vsub.f32 0.0, %v438_v52  ;;  %v410_v44 = vadd.f32 %v1504_v30, %v1540_v39  ;;  %v490_v48 = vadd.f32 %v1506_v31, %v1540_v39 }
 0x14e   : > { %v1030_v59 = vpop.eup %1029  ;;  %1055 = vrcp.f32 %v671_v53  ;;  %v580_v61 = vsub.f32 0.0, %v518_v55  ;;  %v441_v62 = vpop.f32.mrf.mxu0 }
 0x14f   : > { %v521_v63 = vpop.f32.mrf.mxu1  ;;  %v1032_v4 = vpop.eup %1031  ;;  %v716_v0 = vmul.f32 %v1030_v59, %v400_v57  ;;  %1057 = vpow2.f32 %v602_v49  ;;  %v604_v7 = vmul.f32 1.442695, %v564_v58  ;;  %v442_v8 = vadd.f32 %v441_v62, %v1488_v6 }
 0x150   : > { %v1034_v9 = vpop.eup %1033  ;;  %v732_v12 = vmul.f32 %v1032_v4, %v480_v60  ;;  %1059 = vpow2.f32 %v634_v54  ;;  %v636_v10 = vmul.f32 1.442695, %v580_v61  ;;  %v522_v13 = vadd.f32 %v521_v63, %v1488_v6  ;;  %v1554_v14 = vpop.f32.mrf.mxu0 }
 0x151   : > { %v1556_v11 = vpop.f32.mrf.mxu1  ;;  %v1036_v15 = vpop.eup %1035  ;;  %748 = vst [vmem:[%s1560_s28] sm:$0xff] %v716_v0  ;;  %v656_v17 = vadd.f32 1.0, %v1034_v9  ;;  %1061 = vpow2.f32 %v604_v7  ;;  %v565_v18 = vsub.f32 0.0, %v442_v8  ;;  %v414_v0 = vadd.f32 %v1510_v40, %v1540_v39 }
 0x152   : > { %v1038_v23 = vpop.eup %1037  ;;  %764 = vst [vmem:[%s1560_s28 + $0x80] sm:$0xff] %v732_v12  ;;  %v672_v25 = vadd.f32 1.0, %v1036_v15  ;;  %1063 = vpow2.f32 %v636_v10  ;;  %v581_v26 = vsub.f32 0.0, %v522_v13  ;;  %v447_v27 = vpop.f32.mrf.mxu0  ;;  %v494_v12 = vadd.f32 %v1512_v41, %v1540_v39 }
 0x153   : > { %v527_v28 = vpop.f32.mrf.mxu1  ;;  %v1040_v29 = vpop.eup %1039  ;;  %v717_v32 = vmul.f32 %v1038_v23, %v404_v16  ;;  %1065 = vrcp.f32 %v656_v17  ;;  %v606_v33 = vmul.f32 1.442695, %v565_v18  ;;  %v448_v20 = vadd.f32 %v447_v27, %v1488_v6 }
 0x154   : > { %v1042_v34 = vpop.eup %1041  ;;  %v733_v35 = vmul.f32 %v1040_v29, %v484_v24  ;;  %1067 = vrcp.f32 %v672_v25  ;;  %v638_v36 = vmul.f32 1.442695, %v581_v26  ;;  %v528_v37 = vadd.f32 %v527_v28, %v1488_v6  ;;  %v1570_v21 = vpop.f32.mrf.mxu0 }
 0x155   : > { %v1572_v42 = vpop.f32.mrf.mxu1  ;;  %v1044_v43 = vpop.eup %1043  ;;  %749 = vst [vmem:[%s1560_s28 + $0x8] sm:$0xff] %v717_v32  ;;  %v657_v45 = vadd.f32 1.0, %v1042_v34  ;;  %1069 = vpow2.f32 %v606_v33  ;;  %v566_v46 = vsub.f32 0.0, %v448_v20  ;;  %v420_v32 = vadd.f32 %v1516_v50, %v1540_v39 }
 0x156   : > { %v1046_v47 = vpop.eup %1045  ;;  %765 = vst [vmem:[%s1560_s28 + $0x88] sm:$0xff] %v733_v35  ;;  %v673_v49 = vadd.f32 1.0, %v1044_v43  ;;  %1071 = vpow2.f32 %v638_v36  ;;  %v582_v52 = vsub.f32 0.0, %v528_v37  ;;  %v451_v53 = vpop.f32.mrf.mxu0  ;;  %v500_v35 = vadd.f32 %v1518_v51, %v1540_v39 }
 0x157   : > { %v531_v54 = vpop.f32.mrf.mxu1  ;;  %v1048_v55 = vpop.eup %1047  ;;  %v718_v57 = vmul.f32 %v1046_v47, %v410_v44  ;;  %1073 = vrcp.f32 %v657_v45  ;;  %v608_v58 = vmul.f32 1.442695, %v566_v46  ;;  %v452_v30 = vadd.f32 %v451_v53, %v1488_v6 }
 0x158   : > { %v1050_v59 = vpop.eup %1049  ;;  %v734_v60 = vmul.f32 %v1048_v55, %v490_v48  ;;  %1075 = vrcp.f32 %v673_v49  ;;  %v640_v61 = vmul.f32 1.442695, %v582_v52  ;;  %v532_v62 = vadd.f32 %v531_v54, %v1488_v6  ;;  %v1582_v31 = vpop.f32.mrf.mxu0 }
 0x159   : > { %v1584_v63 = vpop.f32.mrf.mxu1  ;;  %v1052_v4 = vpop.eup %1051  ;;  %750 = vst [vmem:[%s1560_s28 + $0x10] sm:$0xff] %v718_v57  ;;  %v658_v7 = vadd.f32 1.0, %v1050_v59  ;;  %1077 = vpow2.f32 %v608_v58  ;;  %v567_v8 = vsub.f32 0.0, %v452_v30  ;;  %v424_v58 = vadd.f32 %v1522_v1, %v1540_v39 }
 0x15a   : > { %v1054_v9 = vpop.eup %1053  ;;  %766 = vst [vmem:[%s1560_s28 + $0x90] sm:$0xff] %v734_v60  ;;  %v674_v10 = vadd.f32 1.0, %v1052_v4  ;;  %1079 = vpow2.f32 %v640_v61  ;;  %v583_v13 = vsub.f32 0.0, %v532_v62  ;;  %v457_v15 = vpop.f32.mrf.mxu0  ;;  %v504_v61 = vadd.f32 %v1524_v2, %v1540_v39 }
 0x15b   : > { %v537_v16 = vpop.f32.mrf.mxu1  ;;  %v1056_v17 = vpop.eup %1055  ;;  %v719_v18 = vmul.f32 %v1054_v9, %v414_v0  ;;  %1081 = vrcp.f32 %v658_v7  ;;  %v610_v23 = vmul.f32 1.442695, %v567_v8  ;;  %v458_v40 = vadd.f32 %v457_v15, %v1488_v6 }
 0x15c   : > { %v1058_v24 = vpop.eup %1057  ;;  %v735_v25 = vmul.f32 %v1056_v17, %v494_v12  ;;  %1083 = vrcp.f32 %v674_v10  ;;  %v642_v26 = vmul.f32 1.442695, %v583_v13  ;;  %v538_v27 = vadd.f32 %v537_v16, %v1488_v6  ;;  %v1594_v41 = vpop.f32.mrf.mxu0 }
 0x15d   : > { %v1596_v28 = vpop.f32.mrf.mxu1  ;;  %v1060_v29 = vpop.eup %1059  ;;  %751 = vst [vmem:[%s1560_s28 + $0x18] sm:$0xff] %v719_v18  ;;  %v659_v33 = vadd.f32 1.0, %v1058_v24  ;;  %1085 = vpow2.f32 %v610_v23  ;;  %v568_v20 = vsub.f32 0.0, %v458_v40  ;;  %v430_v23 = vadd.f32 %v1528_v19, %v1540_v39 }
 0x15e   : > { %v1062_v34 = vpop.eup %1061  ;;  %767 = vst [vmem:[%s1560_s28 + $0x98] sm:$0xff] %v735_v25  ;;  %v675_v36 = vadd.f32 1.0, %v1060_v29  ;;  %1087 = vpow2.f32 %v642_v26  ;;  %v584_v37 = vsub.f32 0.0, %v538_v27  ;;  %v461_v43 = vpop.f32.mrf.mxu0  ;;  %v510_v26 = vadd.f32 %v1530_v22, %v1540_v39 }
 0x15f   : > { %v541_v44 = vpop.f32.mrf.mxu1  ;;  %v1064_v45 = vpop.eup %1063  ;;  %1089 = vrcp.f32 %v659_v33  ;;  %v660_v46 = vadd.f32 1.0, %v1062_v34  ;;  %v612_v47 = vmul.f32 1.442695, %v568_v20  ;;  %v462_v48 = vadd.f32 %v461_v43, %v1488_v6 }
 0x160   : > { %v1066_v50 = vpop.eup %1065  ;;  %1091 = vrcp.f32 %v675_v36  ;;  %v676_v49 = vadd.f32 1.0, %v1064_v45  ;;  %v644_v52 = vmul.f32 1.442695, %v584_v37  ;;  %v542_v53 = vadd.f32 %v541_v44, %v1488_v6  ;;  %v1606_v54 = vpop.f32.mrf.mxu0 }
 0x161   : > { %v1608_v51 = vpop.f32.mrf.mxu1  ;;  %v1068_v55 = vpop.eup %1067  ;;  %v720_v57 = vmul.f32 %v1066_v50, %v420_v32  ;;  %1093 = vrcp.f32 %v660_v46  ;;  %v569_v30 = vsub.f32 0.0, %v462_v48 }
 0x162   : > { %v1070_v59 = vpop.eup %1069  ;;  %v736_v60 = vmul.f32 %v1068_v55, %v500_v35  ;;  %1095 = vrcp.f32 %v676_v49  ;;  %v585_v62 = vsub.f32 0.0, %v542_v53  ;;  %v467_v4 = vpop.f32.mrf.mxu0  ;;  %v434_v49 = vadd.f32 %v1535_v38, %v1540_v39 }
 0x163   : > { %v547_v0 = vpop.f32.mrf.mxu1  ;;  %v1072_v7 = vpop.eup %1071  ;;  %752 = vst [vmem:[%s1560_s28 + $0x20] sm:$0xff] %v720_v57  ;;  %v661_v8 = vadd.f32 1.0, %v1070_v59  ;;  %1097 = vpow2.f32 %v612_v47  ;;  %v614_v9 = vmul.f32 1.442695, %v569_v30  ;;  %v468_v12 = vadd.f32 %v467_v4, %v1488_v6 }
 0x164   : > { %v1074_v1 = vpop.eup %1073  ;;  %768 = vst [vmem:[%s1560_s28 + $0xa0] sm:$0xff] %v736_v60  ;;  %v677_v10 = vadd.f32 1.0, %v1072_v7  ;;  %1099 = vpow2.f32 %v644_v52  ;;  %v646_v13 = vmul.f32 1.442695, %v585_v62  ;;  %v548_v15 = vadd.f32 %v547_v0, %v1488_v6  ;;  %v1618_v2 = vpop.f32.mrf.mxu0 }
 0x165   : > { %v1620_v16 = vpop.f32.mrf.mxu1  ;;  %v1076_v17 = vpop.eup %1075  ;;  %v721_v18 = vmul.f32 %v1074_v1, %v424_v58  ;;  %1101 = vrcp.f32 %v661_v8  ;;  %v570_v40 = vsub.f32 0.0, %v468_v12  ;;  %v440_v60 = vadd.f32 %v1544_v5, %v1540_v39 }
 0x166   : > { %v1078_v24 = vpop.eup %1077  ;;  %v737_v25 = vmul.f32 %v1076_v17, %v504_v61  ;;  %1103 = vrcp.f32 %v677_v10  ;;  %v586_v27 = vsub.f32 0.0, %v548_v15  ;;  %v471_v29 = vpop.f32.mrf.mxu0  ;;  %v520_v62 = vadd.f32 %v1546_v56, %v1540_v39 }
 0x167   : > { %v551_v32 = vpop.f32.mrf.mxu1  ;;  %v1080_v33 = vpop.eup %1079  ;;  %753 = vst [vmem:[%s1560_s28 + $0x28] sm:$0xff] %v721_v18  ;;  %v662_v20 = vadd.f32 1.0, %v1078_v24  ;;  %1105 = vpow2.f32 %v614_v9  ;;  %v616_v34 = vmul.f32 1.442695, %v570_v40  ;;  %v472_v35 = vadd.f32 %v471_v29, %v1488_v6 }
 0x168   : > { %v1082_v19 = vpop.eup %1081  ;;  %769 = vst [vmem:[%s1560_s28 + $0xa8] sm:$0xff] %v737_v25  ;;  %v678_v36 = vadd.f32 1.0, %v1080_v33  ;;  %1107 = vpow2.f32 %v646_v13  ;;  %v648_v37 = vmul.f32 1.442695, %v586_v27  ;;  %v552_v43 = vadd.f32 %v551_v32, %v1488_v6 }
 0x169   : > { %v1084_v22 = vpop.eup %1083  ;;  %v722_v44 = vmul.f32 %v1082_v19, %v430_v23  ;;  %1109 = vrcp.f32 %v662_v20  ;;  %v571_v45 = vsub.f32 0.0, %v472_v35  ;;  %v514_v6 = vadd.f32 %v1537_v3, %v1540_v39 }
 0x16a   : > { %v1086_v46 = vpop.eup %1085  ;;  %v738_v47 = vmul.f32 %v1084_v22, %v510_v26  ;;  %1111 = vrcp.f32 %v678_v36  ;;  %v587_v48 = vsub.f32 0.0, %v552_v43  ;;  %v444_v5 = vadd.f32 %v1554_v14, %v1540_v39 }
 0x16b   : > { %v1088_v50 = vpop.eup %1087  ;;  %754 = vst [vmem:[%s1560_s28 + $0x30] sm:$0xff] %v722_v44  ;;  %v663_v52 = vadd.f32 1.0, %v1086_v46  ;;  %1113 = vpow2.f32 %v616_v34  ;;  %v618_v53 = vmul.f32 1.442695, %v571_v45  ;;  %v524_v56 = vadd.f32 %v1556_v11, %v1540_v39 }
 0x16c   : > { %v1090_v55 = vpop.eup %1089  ;;  %770 = vst [vmem:[%s1560_s28 + $0xb0] sm:$0xff] %v738_v47  ;;  %v679_v57 = vadd.f32 1.0, %v1088_v50  ;;  %1115 = vpow2.f32 %v648_v37  ;;  %v650_v58 = vmul.f32 1.442695, %v587_v48  ;;  %v450_v14 = vadd.f32 %v1570_v21, %v1540_v39 }
 0x16d   : > { %v1092_v30 = vpop.eup %1091  ;;  %v723_v59 = vmul.f32 %v1090_v55, %v434_v49  ;;  %1117 = vrcp.f32 %v663_v52  ;;  %v530_v11 = vadd.f32 %v1572_v42, %v1540_v39  ;;  %v454_v21 = vadd.f32 %v1582_v31, %v1540_v39 }
 0x16e   : > { %v1094_v38 = vpop.eup %1093  ;;  %v739_v61 = vmul.f32 %v1092_v30, %v514_v6  ;;  %1119 = vrcp.f32 %v679_v57  ;;  %v534_v42 = vadd.f32 %v1584_v63, %v1540_v39  ;;  %v460_v44 = vadd.f32 %v1594_v41, %v1540_v39  ;;  %v473_v57 = vpop.f32.mrf.mxu0 }
 0x16f   : > { %v1096_v4 = vpop.eup %1095  ;;  %755 = vst [vmem:[%s1560_s28 + $0x38] sm:$0xff] %v723_v59  ;;  %v724_v3 = vmul.f32 %v1094_v38, %v440_v60  ;;  %1121 = vpow2.f32 %v618_v53  ;;  %v540_v45 = vadd.f32 %v1596_v28, %v1540_v39  ;;  %v464_v50 = vadd.f32 %v1606_v54, %v1540_v39 }
 0x170   : > { %v1098_v0 = vpop.eup %1097  ;;  %771 = vst [vmem:[%s1560_s28 + $0xb8] sm:$0xff] %v739_v61  ;;  %v740_v7 = vmul.f32 %v1096_v4, %v520_v62  ;;  %1123 = vpow2.f32 %v650_v58  ;;  %v544_v41 = vadd.f32 %v1608_v51, %v1540_v39  ;;  %v470_v55 = vadd.f32 %v1618_v2, %v1540_v39  ;;  %v553_v51 = vpop.f32.mrf.mxu1 }
 0x171   : > { %v1100_v8 = vpop.eup %1099  ;;  %756 = vst [vmem:[%s1560_s28 + $0x40] sm:$0xff] %v724_v3  ;;  %v664_v9 = vadd.f32 1.0, %v1098_v0  ;;  %v550_v54 = vadd.f32 %v1620_v16, %v1540_v39  ;;  %v474_v60 = vadd.f32 %v473_v57, %v1540_v39  ;;  %v554_v38 = vadd.f32 %v553_v51, %v1540_v39 }
 0x172   : > { %v1102_v12 = vpop.eup %1101  ;;  %772 = vst [vmem:[%s1560_s28 + $0xc0] sm:$0xff] %v740_v7  ;;  %v680_v1 = vadd.f32 1.0, %v1100_v8 }
 0x173   : > { %v1104_v10 = vpop.eup %1103  ;;  %v725_v13 = vmul.f32 %v1102_v12, %v444_v5  ;;  %1125 = vrcp.f32 %v664_v9 }
 0x174   : > { %v1106_v15 = vpop.eup %1105  ;;  %v741_v17 = vmul.f32 %v1104_v10, %v524_v56  ;;  %1127 = vrcp.f32 %v680_v1 }
 0x175   : > { %v1108_v18 = vpop.eup %1107  ;;  %757 = vst [vmem:[%s1560_s28 + $0x48] sm:$0xff] %v725_v13  ;;  %v665_v23 = vadd.f32 1.0, %v1106_v15 }
 0x176   : > { %v1110_v40 = vpop.eup %1109  ;;  %773 = vst [vmem:[%s1560_s28 + $0xc8] sm:$0xff] %v741_v17  ;;  %v681_v24 = vadd.f32 1.0, %v1108_v18 }
 0x177   : > { %v1112_v25 = vpop.eup %1111  ;;  %v726_v26 = vmul.f32 %v1110_v40, %v450_v14  ;;  %1129 = vrcp.f32 %v665_v23 }
 0x178   : > { %v1114_v27 = vpop.eup %1113  ;;  %v742_v29 = vmul.f32 %v1112_v25, %v530_v11  ;;  %1131 = vrcp.f32 %v681_v24 }
 0x179   : > { %v1116_v32 = vpop.eup %1115  ;;  %758 = vst [vmem:[%s1560_s28 + $0x50] sm:$0xff] %v726_v26  ;;  %v666_v33 = vadd.f32 1.0, %v1114_v27 }
 0x17a   : > { %v1118_v20 = vpop.eup %1117  ;;  %774 = vst [vmem:[%s1560_s28 + $0xd0] sm:$0xff] %v742_v29  ;;  %v682_v34 = vadd.f32 1.0, %v1116_v32 }
 0x17b   : > { %v1120_v35 = vpop.eup %1119  ;;  %v727_v19 = vmul.f32 %v1118_v20, %v454_v21  ;;  %1133 = vrcp.f32 %v666_v33 }
 0x17c   : > { %v1122_v36 = vpop.eup %1121  ;;  %v743_v37 = vmul.f32 %v1120_v35, %v534_v42  ;;  %1135 = vrcp.f32 %v682_v34 }
 0x17d   : > { %v1124_v43 = vpop.eup %1123  ;;  %759 = vst [vmem:[%s1560_s28 + $0x58] sm:$0xff] %v727_v19  ;;  %v667_v22 = vadd.f32 1.0, %v1122_v36 }
 0x17e   : > { %775 = vst [vmem:[%s1560_s28 + $0xd8] sm:$0xff] %v743_v37  ;;  %v683_v31 = vadd.f32 1.0, %v1124_v43 }
 0x17f   : > { %1137 = vrcp.f32 %v667_v22 }
 0x180   : > { %v1126_v63 = vpop.eup %1125  ;;  %1139 = vrcp.f32 %v683_v31 }
 0x181   : > { %v1128_v46 = vpop.eup %1127  ;;  %v728_v47 = vmul.f32 %v1126_v63, %v460_v44 }
 0x182   : > { %v744_v48 = vmul.f32 %v1128_v46, %v540_v45 }
 0x183   : > { %760 = vst [vmem:[%s1560_s28 + $0x60] sm:$0xff] %v728_v47 }
 0x184   : > { %v1130_v49 = vpop.eup %1129  ;;  %776 = vst [vmem:[%s1560_s28 + $0xe0] sm:$0xff] %v744_v48 }
 0x185   : > { %v1132_v52 = vpop.eup %1131  ;;  %v729_v53 = vmul.f32 %v1130_v49, %v464_v50 }
 0x186   : > { %v745_v28 = vmul.f32 %v1132_v52, %v544_v41 }
 0x187   : > { %761 = vst [vmem:[%s1560_s28 + $0x68] sm:$0xff] %v729_v53 }
 0x188   : > { %v1134_v6 = vpop.eup %1133  ;;  %777 = vst [vmem:[%s1560_s28 + $0xe8] sm:$0xff] %v745_v28 }
 0x189   : > { %v1136_v58 = vpop.eup %1135  ;;  %v730_v30 = vmul.f32 %v1134_v6, %v470_v55 }
 0x18a   : > { %v746_v59 = vmul.f32 %v1136_v58, %v550_v54 }
 0x18b   : > { %762 = vst [vmem:[%s1560_s28 + $0x70] sm:$0xff] %v730_v30 }
 0x18c   : > { %v1138_v2 = vpop.eup %1137  ;;  %778 = vst [vmem:[%s1560_s28 + $0xf0] sm:$0xff] %v746_v59 }
 0x18d   : > { %v1140_v61 = vpop.eup %1139  ;;  %v731_v16 = vmul.f32 %v1138_v2, %v474_v60 }
 0x18e   : > { %v747_v62 = vmul.f32 %v1140_v61, %v554_v38 }
 0x18f   : > { %763 = vst [vmem:[%s1560_s28 + $0x78] sm:$0xff] %v731_v16 }
 0x190   : > { %779 = vst [vmem:[%s1560_s28 + $0xf8] sm:$0xff] %v747_v62 }
 0x191   : > { %1208 = shalt.err (!%p1205_p0)
}
 0x192   : > { %s1209_s11 = scalar_lea.hbm %s1687_s4, 4096  ;;  %s1213_s30 = scalar_lea.hbm %s1737_s3, 8192 }
 0x193   : > { %p1210_p5 = scmp.ne.s32.totalorder %s1687_s4, %s1209_s11  ;;  %p1214_p4 = scmp.lt.s32.totalorder %s1687_s4, %s1737_s3 }
 0x194   : > { %p1215_p6 = scmp.lt.s32.totalorder %s1213_s30, %s1209_s11 }
 0x195   : > { %p1211_p2 = pnand %p1210_p5, %p1753_p11 }
 0x196   : > { %p1216_p8 = por %p1215_p6, %p1214_p4 }
 0x197   : > { %p1212_p1 = pneg %p1211_p2 }
 0x199   : > { %p1217_p3 = pnand %p1216_p8, %p1212_p1 }
 0x19b   : > { %1220 = shalt.err (!%p1217_p3)
}
 0x19c   : > { %s1271_s20 = smov 128   ;;  %s1272_s28 = smov 8  }
 0x19d   : > { %933 = dma.vmem_to_hbm [thread:$0]  (%p1753_p11), %s1689_s17, 4096, %s1687_s4, %s781_s16, %s1271_s20, %s1271_s20, %s1272_s28  }
 0x19e PF: > { %s809_s29 = sand.u32 1, %s1251_s12   ;;  %p1754_p7 = scmp.ne.s32.totalorder %s1743_s19, 0 }
 0x19f   : > { %p1755_p9 = scmp.ge.s32.totalorder %s1263_s15, 2  ;;  %s810_s22 = scalar_lea.sflag [#allocation4], %s809_s29 }
 0x1a1   : > { %p944_p10 = pnand %p1755_p9, %p1754_p7 }
 0x1a3   : > { %p945_p12 = pneg %p944_p10 }
 0x1a5   : > { %1246 = dma.done.wait (%p945_p12), %s810_s22, 4096  }
 0x1a6   : > { %1248 = vsyncadd (%p945_p12), %s810_s22, 4294963200  ;;  %p17_p13 = scmp.ge.s32.totalorder %s1347_s24, 4   ;;  %s1756_s12 = smov %s1255_s13 }
 0x1a7   : > { %s1757_s13 = smov %s1259_s14  ;;  %s1758_s14 = smov %s1367_s5 }
 0x1a8   : > { %s1759_s15 = smov %s1347_s24  ;;  %19 = sbr.rel (!%p17_p13) target bundleno = 6 (0x6), region = 81 }
 0x1ad   :  { %815 = vsyncpa [#allocation3], 1 }
 0x1ae   :  { %817 = vsyncpa [#allocation3 + $0x1], 1 }
 0x1af   :  { %818 = vsyncpa [#allocation6], 1 }
 0x1b0   :  { %819 = vsyncpa [#allocation4], 1 }
 0x1b1   :  { %821 = vsyncpa [#allocation4 + $0x1], 1 }

// kernel: tpu_custom_call.1
= control target key start
LH: loop header
LB: loop body
LE: loop exit
PB: predicated region body
PF: predicated region fallthrough
CT: control target
= control target key end

     0   :  { %8 = vsyncpa [#allocation3], 0  ;;  %s1734_s0 = inlined_call_operand.hbm [shape: f32[512,128], index: 0, kind: input, shape index: {}]   ;;  %s1735_s1 = inlined_call_operand.hbm [shape: bf16[128,256], index: 1, kind: input, shape index: {}]   ;;  %s1736_s2 = inlined_call_operand.vmem [shape: f32[1,256], index: 2, kind: input, shape index: {}]   ;;  %s1737_s3 = inlined_call_operand.hbm [shape: f32[512,128], index: 3, kind: output, shape index: {}]  }
   0x1   :  { %10 = vsyncpa [#allocation3 + $0x1], 0 }
   0x2   :  { %11 = vsyncpa [#allocation6], 0 }
   0x3   :  { %12 = vsyncpa [#allocation4], 0 }
   0x4   :  { %14 = vsyncpa [#allocation4 + $0x1], 0  ;;  %s1293_s12 = smov 0   ;;  %s1295_s13 = smov 0  }
   0x5   :  { %s1297_s14 = smov 0   ;;  %s1299_s15 = smov 0  }
   0x6 LB: > { %s1314_s16 = sadd.s32 4294967295, %s1263_s15   ;;  %s877_s17 = sadd.s32 4294967294, %s1263_s15   ;;  %s1263_s15 = sphi %s1299_s15, %s1759_s15   ;;  %s1259_s14 = sphi %s1297_s14, %s1758_s14   ;;  %s1255_s13 = sphi %s1295_s13, %s1757_s13   ;;  %s1251_s12 = sphi %s1293_s12, %s1756_s12  }
   0x7   : > { %p40_p0 = scmp.ne.s32.totalorder %s1255_s13, %s1251_s12  ;;  %p1738_p1 = scmp.eq.s32.totalorder %s1314_s16, 0 }
   0x8   : > { %p112_p3 = scmp.eq.s32.totalorder %s877_s17, 1  ;;  %p878_p5 = scmp.ge.s32.totalorder %s1263_s15, 1 }
   0x9   : > { %p1323_p4 = por %p1738_p1, %p40_p0  ;;  %p119_p7 = scmp.lt.s32.totalorder %s1263_s15, 3 }
   0xa   : > { %p1328_p6 = por %p112_p3, %p40_p0  ;;  %s1265_s21 = smov [#allocation5]  }
   0xb   : > { %s1742_s18 = scalar_select %p1323_p4, 1, 0 }
   0xc   : > { %s1743_s19 = scalar_select %p1328_p6, 1, 0 }
   0xd   : > { %p1333_p8 = pnand %p878_p5, %p119_p7  ;;  %s131_s22 = sshll.u32 %s1265_s21, 4  ;;  %s132_s22 = int_to_ptr.vmem [resolvable:$true] %s131_s22 }
   0xe   : > { %s1347_s24 = sadd.s32 1, %s1263_s15   ;;  %s27_s25 = sadd.s32 1, %s1259_s14 }
   0xf   : > { %s1744_s20 = scalar_select %p1333_p8, 1, 0 }
  0x10   : > { %p935_p9 = pneg %p1333_p8  ;;  %s24_s26 = ssub.s32 %s1263_s15, %s1347_s24 }
  0x11   : > { %s1152_s27 = scalar_lea.vmem %s132_s22, 2048  ;;  %p1160_p5 = scmp.lt.s32.totalorder %s132_s22, %s132_s22 }
  0x12   : > { %p1342_p11 = pnand %p935_p9, %p1738_p1  ;;  %p1153_p13 = scmp.ne.s32.totalorder %s132_s22, %s1152_s27 }
  0x13   : > { %p1161_p7 = scmp.lt.s32.totalorder %s1152_s27, %s1152_s27 }
  0x14   : > { %p1143_p12 = pneg %p1342_p11 }
  0x15   : > { %p1162_p10 = por %p1161_p7, %p1160_p5 }
  0x16   : > { %p1155_p0 = pnand %p1153_p13, %p1143_p12 }
  0x18   : > { %p1156_p3 = pneg %p1155_p0 }
  0x1a   : > { %p1163_p2 = pnand %p1162_p10, %p1156_p3 }
  0x1c   : > { %1166 = shalt.err (!%p1163_p2)
}
  0x1d   : > { %s1266_s28 = smov 128   ;;  %s1267_s29 = smov 8  }
  0x1e   : > { %938 = dma.hbm_to_vmem [thread:$0]  (!%p1342_p11), %s1735_s1, 2048, %s132_s22, [#allocation6], %s1266_s28, %s1266_s28, %s1267_s29  }
  0x1f   : > { %p25_p2 = scmp.eq.s32.totalorder %s24_s26, 0  ;;  %p34_p9 = scmp.ne.s32.totalorder %s1259_s14, %s1255_s13 }
  0x20   : > { %p35_p10 = scmp.eq.s32.totalorder %s1263_s15, 0  ;;  %p948_p12 = scmp.lt.s32.totalorder %s1263_s15, 2 }
  0x21   : > { %s1367_s5 = scalar_select %p25_p2, %s1259_s14, %s27_s25  }
  0x22   : > { %p36_p13 = por %p35_p10, %p34_p9  ;;  %p1746_p0 = scmp.eq.s32.totalorder %s1314_s16, 1 }
  0x23   : > { %s148_s7 = sand.u32 1, %s1259_s14   ;;  %s909_s8 = sshll.u32 %s1263_s15, 12 }
  0x24   : > { %p1371_p3 = por %p1746_p0, %p34_p9  ;;  %s881_s9 = sshll.u32 %s148_s7, 8 }
  0x25   : > { %s1380_s17 = scalar_lea.hbm %s1734_s0, %s909_s8  ;;  %s152_s21 = scalar_lea.vmem [#allocation2], %s881_s9 }
  0x26   : > { %s1747_s6 = scalar_select %p1371_p3, 1, 0 }
  0x27   : > { %s159_s22 = sshll.u32 %s152_s21, 4  ;;  %p1382_p11 = pnand %p948_p12, %p36_p13  ;;  %s1386_s22 = int_to_ptr.vmem [resolvable:$true] %s159_s22 }
  0x28   : > { %s1388_s25 = scalar_lea.sflag [#allocation3], %s148_s7  ;;  %s1167_s26 = scalar_lea.hbm %s1380_s17, 4096 }
  0x29   : > { %p1168_p5 = scmp.ne.s32.totalorder %s1380_s17, %s1167_s26  ;;  %p1169_p7 = pneg %p1382_p11 }
  0x2a   : > { %s1172_s4 = scalar_lea.hbm %s1734_s0, 8192  ;;  %p1173_p10 = scmp.lt.s32.totalorder %s1380_s17, %s1734_s0 }
  0x2b   : > { %p1170_p2 = pnand %p1169_p7, %p1168_p5  ;;  %p1174_p12 = scmp.lt.s32.totalorder %s1172_s4, %s1167_s26 }
  0x2d   : > { %p1171_p9 = pneg %p1170_p2  ;;  %p1175_p13 = por %p1174_p12, %p1173_p10 }
  0x2f   : > { %p1176_p0 = pnand %p1175_p13, %p1171_p9 }
  0x31   : > { %1179 = shalt.err (!%p1176_p0)
}
  0x32   : > { %s1180_s7 = scalar_lea.vmem %s1386_s22, 4096  ;;  %s1268_s10 = smov [#allocation2]  }
  0x33   : > { %p1181_p1 = scmp.ne.s32.totalorder %s1386_s22, %s1180_s7  ;;  %s1185_s11 = sshll.u32 %s1268_s10, 4  ;;  %s1186_s11 = int_to_ptr.vmem [resolvable:$false] %s1185_s11 }
  0x34   : > { %s1187_s21 = scalar_lea.vmem %s1186_s11, 8192  ;;  %p1188_p2 = scmp.lt.s32.totalorder %s1386_s22, %s1186_s11 }
  0x35   : > { %p1183_p6 = pnand %p1181_p1, %p1169_p7  ;;  %p1189_p3 = scmp.lt.s32.totalorder %s1187_s21, %s1180_s7 }
  0x37   : > { %p1184_p5 = pneg %p1183_p6  ;;  %p1190_p4 = por %p1189_p3, %p1188_p2 }
  0x39   : > { %p1191_p8 = pnand %p1190_p4, %p1184_p5 }
  0x3b   : > { %1194 = shalt.err (!%p1191_p8)
}
  0x3c   : > { %942 = dma.hbm_to_vmem [thread:$0]  (!%p1382_p11), %s1380_s17, 4096, %s1386_s22, %s1388_s25, %s1266_s28, %s1266_s28, %s1267_s29  }
  0x3d   : > { %p1749_p1 = scmp.ne.s32.totalorder %s1744_s20, 0 }
  0x3e   : > { %s1415_s26 = sand.u32 (!%p1749_p1), 1, %s1255_s13   ;;  %p1750_p4 = scmp.ne.s32.totalorder (!%p1749_p1), %s1742_s18, 0 }
  0x3f   : > { %171 = sbr.rel (%p1749_p1) target bundleno = 414 (0x19e), region = 32  ;;  %s885_s27 = sshll.u32 (!%p1749_p1), %s1415_s26, 8 }
  0x40   : > { %s174_s30 = scalar_lea.sflag (!%p1749_p1), [#allocation3], %s1415_s26  ;;  %s1421_s23 = scalar_lea.vmem (!%p1749_p1), [#allocation2], %s885_s27 }
  0x44   : > { %1238 = dma.done.wait (%p1750_p4), %s174_s30, 4096  }
  0x45   : > { %1240 = vsyncadd (%p1750_p4), %s174_s30, 4294963200  ;;  %p1751_p6 = scmp.eq.s32.totalorder %s1314_s16, 0 }
  0x47   : > { %1242 = dma.done.wait (%p1751_p6), [#allocation6], 2048   ;;  %p1752_p8 = pmov %p1751_p6 }
  0x48   : > { %v1269_v0 = vmov 0   ;;  %v989_v1 = vld [vmem:[#allocation5 + $0x74] ss:$8 sps:$4 sm:$0xff]   ;;  %v991_v2 = vld [vmem:[#allocation5 + $0x70] ss:$8 sps:$4 sm:$0xff]   ;;  %v207_v17 = vld [vmem:[%s1421_s23] sm:$0xff] }
  0x49   : > { %1244 = vsyncadd (%p1752_p8), [#allocation6], 4294965248  ;;  %395 = vmatprep.mubr.bf16.mxu0 %v1269_v0  ;;  %475 = vmatprep.mubr.bf16.mxu1 %v1269_v0  ;;  %v992_v3 = vld [vmem:[#allocation5 + $0x64] ss:$8 sps:$4 sm:$0xff]   ;;  %v994_v4 = vld [vmem:[#allocation5 + $0x60] ss:$8 sps:$4 sm:$0xff]  }
  0x4a   : > { %363 = vmatprep.subr.bf16.mxu0 %v989_v1  ;;  %911 = vmatprep.subr.bf16.mxu1 %v989_v1  ;;  %v995_v5 = vld [vmem:[#allocation5 + $0x54] ss:$8 sps:$4 sm:$0xff]   ;;  %v997_v6 = vld [vmem:[#allocation5 + $0x50] ss:$8 sps:$4 sm:$0xff]   ;;  %v998_v7 = vld [vmem:[#allocation5 + $0x44] ss:$8 sps:$4 sm:$0xff]  }
  0x4b   : > { %364 = vmatpush1.bf16.msra.mxu0 %v991_v2  ;;  %919 = vmatpush1.bf16.msra.mxu1 %v991_v2  ;;  %v1000_v8 = vld [vmem:[#allocation5 + $0x40] ss:$8 sps:$4 sm:$0xff]   ;;  %v1001_v9 = vld [vmem:[#allocation5 + $0x34] ss:$8 sps:$4 sm:$0xff]   ;;  %v1003_v10 = vld [vmem:[#allocation5 + $0x30] ss:$8 sps:$4 sm:$0xff]   ;;  %v273_v2 = vlaneseq }
  0x4c   : > { %365 = vmatprep.subr.bf16.mxu0 %v992_v3  ;;  %912 = vmatprep.subr.bf16.mxu1 %v992_v3  ;;  %v1004_v11 = vld [vmem:[#allocation5 + $0x24] ss:$8 sps:$4 sm:$0xff]   ;;  %v1006_v12 = vld [vmem:[#allocation5 + $0x20] ss:$8 sps:$4 sm:$0xff]   ;;  %v1007_v13 = vld [vmem:[#allocation5 + $0x14] ss:$8 sps:$4 sm:$0xff]  }
  0x4d   : > { %v1009_v14 = vld [vmem:[#allocation5 + $0x10] ss:$8 sps:$4 sm:$0xff]   ;;  %v1010_v15 = vld [vmem:[#allocation5 + $0x4] ss:$8 sps:$4 sm:$0xff]   ;;  %v1012_v16 = vld [vmem:[#allocation5] ss:$8 sps:$4 sm:$0xff]  }
  0x4e   : > { %v208_v18 = vld [vmem:[%s1421_s23 + $0x8] sm:$0xff]  ;;  %v223_v19 = vld [vmem:[%s1421_s23 + $0x80] sm:$0xff]  ;;  %v209_v23 = vld [vmem:[%s1421_s23 + $0x10] sm:$0xff]  ;;  %v1479_v3 = vshrl.u32 %v273_v2, 7  ;;  %s1560_s28 = scalar_lea.vmem [#allocation7], %s885_s27  ;;  %s910_s29 = sshll.u32 %s1314_s16, 12 }
  0x4f   : > { %366 = vmatpush1.bf16.msra.mxu0 %v994_v4  ;;  %920 = vmatpush1.bf16.msra.mxu1 %v994_v4  ;;  %v224_v20 = vld [vmem:[%s1421_s23 + $0x88] sm:$0xff]  ;;  %v239_v21 = vpack.c.bf16 %v208_v18, %v207_v17  ;;  %v210_v24 = vld [vmem:[%s1421_s23 + $0x18] sm:$0xff]  ;;  %v225_v25 = vld [vmem:[%s1421_s23 + $0x90] sm:$0xff]  ;;  %s794_s17 = sshll.u32 %s1560_s28, 4  ;;  %s1687_s4 = scalar_lea.hbm %s1737_s3, %s910_s29  ;;  %s1689_s17 = int_to_ptr.vmem [resolvable:$true] %s794_s17 }
  0x50   : > { %367 = vmatprep.subr.bf16.mxu0 %v995_v5  ;;  %913 = vmatprep.subr.bf16.mxu1 %v995_v5  ;;  %v247_v22 = vpack.c.bf16 %v224_v20, %v223_v19  ;;  %v226_v26 = vld [vmem:[%s1421_s23 + $0x98] sm:$0xff]  ;;  %v240_v27 = vpack.c.bf16 %v210_v24, %v209_v23  ;;  %v211_v29 = vld [vmem:[%s1421_s23 + $0x20] sm:$0xff]  ;;  %v212_v30 = vld [vmem:[%s1421_s23 + $0x28] sm:$0xff]  ;;  %v275_v4 = vsub.s32 0, %v1479_v3  ;;  %s781_s16 = scalar_lea.sflag [#allocation4], %s1415_s26  ;;  %s1195_s8 = scalar_lea.vmem %s1689_s17, 4096 }
  0x51   : > { %v248_v28 = vpack.c.bf16 %v226_v26, %v225_v25  ;;  %v227_v31 = vld [vmem:[%s1421_s23 + $0xa0] sm:$0xff]  ;;  %v228_v32 = vld [vmem:[%s1421_s23 + $0xa8] sm:$0xff]  ;;  %v241_v33 = vpack.c.bf16 %v212_v30, %v211_v29  ;;  %v213_v35 = vld [vmem:[%s1421_s23 + $0x30] sm:$0xff]  ;;  %p1196_p3 = scmp.ne.s32.totalorder %s1689_s17, %s1195_s8  ;;  %p1753_p11 = scmp.ne.s32.totalorder %s1747_s6, 0 }
  0x52   : > { %v249_v34 = vpack.c.bf16 %v228_v32, %v227_v31  ;;  %v214_v36 = vld [vmem:[%s1421_s23 + $0x38] sm:$0xff]  ;;  %v229_v37 = vld [vmem:[%s1421_s23 + $0xb0] sm:$0xff]  ;;  %v215_v41 = vld [vmem:[%s1421_s23 + $0x40] sm:$0xff]  ;;  %s1270_s9 = smov [#allocation7]  }
  0x53   : > { %368 = vmatpush1.bf16.msra.mxu0 %v997_v6  ;;  %921 = vmatpush1.bf16.msra.mxu1 %v997_v6  ;;  %v230_v38 = vld [vmem:[%s1421_s23 + $0xb8] sm:$0xff]  ;;  %v242_v39 = vpack.c.bf16 %v214_v36, %v213_v35  ;;  %v216_v42 = vld [vmem:[%s1421_s23 + $0x48] sm:$0xff]  ;;  %v231_v43 = vld [vmem:[%s1421_s23 + $0xc0] sm:$0xff]  ;;  %p1197_p7 = pnand %p1196_p3, %p1753_p11  ;;  %s1199_s7 = sshll.u32 %s1270_s9, 4  ;;  %s1200_s7 = int_to_ptr.vmem [resolvable:$false] %s1199_s7 }
  0x54   : > { %369 = vmatprep.subr.bf16.mxu0 %v998_v7  ;;  %914 = vmatprep.subr.bf16.mxu1 %v998_v7  ;;  %v250_v40 = vpack.c.bf16 %v230_v38, %v229_v37  ;;  %v232_v44 = vld [vmem:[%s1421_s23 + $0xc8] sm:$0xff]  ;;  %v243_v45 = vpack.c.bf16 %v216_v42, %v215_v41  ;;  %v217_v47 = vld [vmem:[%s1421_s23 + $0x50] sm:$0xff]  ;;  %v218_v48 = vld [vmem:[%s1421_s23 + $0x58] sm:$0xff]  ;;  %s1201_s10 = scalar_lea.vmem %s1200_s7, 8192  ;;  %p1202_p10 = scmp.lt.s32.totalorder %s1689_s17, %s1200_s7 }
  0x55   : > { %v251_v46 = vpack.c.bf16 %v232_v44, %v231_v43  ;;  %v233_v49 = vld [vmem:[%s1421_s23 + $0xd0] sm:$0xff]  ;;  %v234_v50 = vld [vmem:[%s1421_s23 + $0xd8] sm:$0xff]  ;;  %v244_v51 = vpack.c.bf16 %v218_v48, %v217_v47  ;;  %v219_v53 = vld [vmem:[%s1421_s23 + $0x60] sm:$0xff]  ;;  %p1198_p9 = pneg %p1197_p7  ;;  %p1203_p12 = scmp.lt.s32.totalorder %s1201_s10, %s1195_s8 }
  0x56   : > { %v252_v52 = vpack.c.bf16 %v234_v50, %v233_v49  ;;  %v220_v54 = vld [vmem:[%s1421_s23 + $0x68] sm:$0xff]  ;;  %v235_v55 = vld [vmem:[%s1421_s23 + $0xe0] sm:$0xff]  ;;  %v221_v59 = vld [vmem:[%s1421_s23 + $0x70] sm:$0xff] }
  0x57   : > { %370 = vmatpush1.bf16.msra.mxu0 %v1000_v8  ;;  %922 = vmatpush1.bf16.msra.mxu1 %v1000_v8  ;;  %v236_v56 = vld [vmem:[%s1421_s23 + $0xe8] sm:$0xff]  ;;  %v245_v57 = vpack.c.bf16 %v220_v54, %v219_v53  ;;  %v222_v60 = vld [vmem:[%s1421_s23 + $0x78] sm:$0xff]  ;;  %v237_v61 = vld [vmem:[%s1421_s23 + $0xf0] sm:$0xff]  ;;  %p1204_p13 = por %p1203_p12, %p1202_p10 }
  0x58   : > { %371 = vmatprep.subr.bf16.mxu0 %v1001_v9  ;;  %915 = vmatprep.subr.bf16.mxu1 %v1001_v9  ;;  %v253_v58 = vpack.c.bf16 %v236_v56, %v235_v55  ;;  %v238_v62 = vld [vmem:[%s1421_s23 + $0xf8] sm:$0xff]  ;;  %v246_v63 = vpack.c.bf16 %v222_v60, %v221_v59  ;;  %v1485_v5 = vld [vmem:[%s1736_s2] sm:$0x3] }
  0x59   : > { %v254_v1 = vpack.c.bf16 %v238_v62, %v237_v61  ;;  %v1488_v6 = vrot.slane %v1485_v5, %v275_v4  ;;  %p1205_p0 = pnand %p1204_p13, %p1198_p9 }
  0x5b   : > { %372 = vmatpush1.bf16.msra.mxu0 %v1003_v10  ;;  %923 = vmatpush1.bf16.msra.mxu1 %v1003_v10 }
  0x5c   : > { %373 = vmatprep.subr.bf16.mxu0 %v1004_v11  ;;  %916 = vmatprep.subr.bf16.mxu1 %v1004_v11 }
  0x5f   : > { %374 = vmatpush1.bf16.msra.mxu0 %v1006_v12  ;;  %924 = vmatpush1.bf16.msra.mxu1 %v1006_v12 }
  0x60   : > { %375 = vmatprep.subr.bf16.mxu0 %v1007_v13  ;;  %917 = vmatprep.subr.bf16.mxu1 %v1007_v13 }
  0x63   : > { %376 = vmatpush1.bf16.msra.mxu0 %v1009_v14  ;;  %925 = vmatpush1.bf16.msra.mxu1 %v1009_v14 }
  0x64   : > { %377 = vmatprep.subr.bf16.mxu0 %v1010_v15  ;;  %918 = vmatprep.subr.bf16.mxu1 %v1010_v15 }
  0x67   : > { %378 = vmatpush1.bf16.msra.mxu0 %v1012_v16  ;;  %926 = vmatpush1.bf16.msra.mxu1 %v1012_v16 }
  0x6a   : > { %396 = vmatmul.mubr.bf16.vlgmr.msra.gmra.mxu0 %v239_v21  ;;  %476 = vmatmul.mubr.bf16.vlgmr.msra.gmra.mxu1 %v247_v22 }
  0x6b   : > { %405 = vmatprep.mubr.bf16.mxu0 %v1269_v0  ;;  %485 = vmatprep.mubr.bf16.mxu1 %v1269_v0 }
  0x72   : > { %406 = vmatmul.mubr.bf16.gmra.mxu0 %v240_v27  ;;  %486 = vmatmul.mubr.bf16.gmra.mxu1 %v248_v28 }
  0x73   : > { %415 = vmatprep.mubr.bf16.mxu0 %v1269_v0  ;;  %495 = vmatprep.mubr.bf16.mxu1 %v1269_v0 }
  0x7a   : > { %416 = vmatmul.mubr.bf16.gmra.mxu0 %v241_v33  ;;  %496 = vmatmul.mubr.bf16.gmra.mxu1 %v249_v34 }
  0x7b   : > { %425 = vmatprep.mubr.bf16.mxu0 %v1269_v0  ;;  %505 = vmatprep.mubr.bf16.mxu1 %v1269_v0 }
  0x82   : > { %426 = vmatmul.mubr.bf16.gmra.mxu0 %v242_v39  ;;  %506 = vmatmul.mubr.bf16.gmra.mxu1 %v250_v40 }
  0x83   : > { %435 = vmatprep.mubr.bf16.mxu0 %v1269_v0  ;;  %515 = vmatprep.mubr.bf16.mxu1 %v1269_v0 }
  0x8a   : > { %436 = vmatmul.mubr.bf16.gmra.mxu0 %v243_v45  ;;  %516 = vmatmul.mubr.bf16.gmra.mxu1 %v251_v46 }
  0x8b   : > { %445 = vmatprep.mubr.bf16.mxu0 %v1269_v0  ;;  %525 = vmatprep.mubr.bf16.mxu1 %v1269_v0 }
  0x92   : > { %446 = vmatmul.mubr.bf16.gmra.mxu0 %v244_v51  ;;  %526 = vmatmul.mubr.bf16.gmra.mxu1 %v252_v52 }
  0x93   : > { %455 = vmatprep.mubr.bf16.mxu0 %v1269_v0  ;;  %535 = vmatprep.mubr.bf16.mxu1 %v1269_v0 }
  0x9a   : > { %456 = vmatmul.mubr.bf16.gmra.mxu0 %v245_v57  ;;  %536 = vmatmul.mubr.bf16.gmra.mxu1 %v253_v58 }
  0x9b   : > { %465 = vmatprep.mubr.bf16.mxu0 %v1269_v0  ;;  %545 = vmatprep.mubr.bf16.mxu1 %v1269_v0 }
  0xa2   : > { %466 = vmatmul.mubr.bf16.gmra.mxu0 %v246_v63  ;;  %546 = vmatmul.mubr.bf16.gmra.mxu1 %v254_v1 }
 0x12a   : > { %v397_v0 = vpop.f32.mrf.mxu0  ;;  %v477_v7 = vpop.f32.mrf.mxu1 }
 0x12b   : > { %v398_v8 = vadd.f32 %v397_v0, %v1488_v6  ;;  %v478_v9 = vadd.f32 %v477_v7, %v1488_v6 }
 0x12c   : > { %v1492_v10 = vpop.f32.mrf.mxu0  ;;  %v1494_v11 = vpop.f32.mrf.mxu1 }
 0x12d   : > { %v556_v12 = vsub.f32 0.0, %v398_v8  ;;  %v572_v13 = vsub.f32 0.0, %v478_v9 }
 0x12e   : > { %v401_v14 = vpop.f32.mrf.mxu0  ;;  %v481_v15 = vpop.f32.mrf.mxu1 }
 0x12f   : > { %v588_v16 = vmul.f32 1.442695, %v556_v12  ;;  %v620_v17 = vmul.f32 1.442695, %v572_v13  ;;  %v402_v18 = vadd.f32 %v401_v14, %v1488_v6  ;;  %v482_v19 = vadd.f32 %v481_v15, %v1488_v6 }
 0x130   : > { %v1498_v20 = vpop.f32.mrf.mxu0  ;;  %v1500_v21 = vpop.f32.mrf.mxu1 }
 0x131   : > { %1013 = vpow2.f32 %v588_v16  ;;  %v557_v22 = vsub.f32 0.0, %v402_v18  ;;  %v573_v23 = vsub.f32 0.0, %v482_v19 }
 0x132   : > { %1015 = vpow2.f32 %v620_v17  ;;  %v407_v24 = vpop.f32.mrf.mxu0  ;;  %v487_v25 = vpop.f32.mrf.mxu1 }
 0x133   : > { %v590_v26 = vmul.f32 1.442695, %v557_v22  ;;  %v622_v27 = vmul.f32 1.442695, %v573_v23  ;;  %v408_v28 = vadd.f32 %v407_v24, %v1488_v6  ;;  %v488_v29 = vadd.f32 %v487_v25, %v1488_v6 }
 0x134   : > { %v1504_v30 = vpop.f32.mrf.mxu0  ;;  %v1506_v31 = vpop.f32.mrf.mxu1  ;;  %v279_v23 = vsub.s32 1, %v1479_v3 }
 0x135   : > { %1017 = vpow2.f32 %v590_v26  ;;  %v558_v32 = vsub.f32 0.0, %v408_v28  ;;  %v574_v33 = vsub.f32 0.0, %v488_v29 }
 0x136   : > { %1019 = vpow2.f32 %v622_v27  ;;  %v411_v34 = vpop.f32.mrf.mxu0  ;;  %v491_v35 = vpop.f32.mrf.mxu1 }
 0x137   : > { %v592_v36 = vmul.f32 1.442695, %v558_v32  ;;  %v624_v37 = vmul.f32 1.442695, %v574_v33  ;;  %v412_v38 = vadd.f32 %v411_v34, %v1488_v6  ;;  %v492_v39 = vadd.f32 %v491_v35, %v1488_v6 }
 0x138   : > { %v1510_v40 = vpop.f32.mrf.mxu0  ;;  %v1512_v41 = vpop.f32.mrf.mxu1 }
 0x139   : > { %1021 = vpow2.f32 %v592_v36  ;;  %v559_v42 = vsub.f32 0.0, %v412_v38  ;;  %v575_v43 = vsub.f32 0.0, %v492_v39  ;;  %v1540_v39 = vrot.slane %v1485_v5, %v279_v23 }
 0x13a   : > { %1023 = vpow2.f32 %v624_v37  ;;  %v417_v44 = vpop.f32.mrf.mxu0  ;;  %v497_v45 = vpop.f32.mrf.mxu1 }
 0x13b   : > { %v594_v46 = vmul.f32 1.442695, %v559_v42  ;;  %v626_v47 = vmul.f32 1.442695, %v575_v43  ;;  %v418_v48 = vadd.f32 %v417_v44, %v1488_v6  ;;  %v498_v49 = vadd.f32 %v497_v45, %v1488_v6 }
 0x13c   : > { %v1516_v50 = vpop.f32.mrf.mxu0  ;;  %v1518_v51 = vpop.f32.mrf.mxu1 }
 0x13d   : > { %1025 = vpow2.f32 %v594_v46  ;;  %v560_v52 = vsub.f32 0.0, %v418_v48  ;;  %v576_v53 = vsub.f32 0.0, %v498_v49 }
 0x13e   : > { %v1014_v54 = vpop.eup %1013  ;;  %1027 = vpow2.f32 %v626_v47  ;;  %v421_v55 = vpop.f32.mrf.mxu0 }
 0x13f   : > { %v501_v56 = vpop.f32.mrf.mxu1  ;;  %v1016_v57 = vpop.eup %1015  ;;  %v652_v58 = vadd.f32 1.0, %v1014_v54  ;;  %v596_v59 = vmul.f32 1.442695, %v560_v52  ;;  %v422_v60 = vadd.f32 %v421_v55, %v1488_v6  ;;  %v628_v62 = vmul.f32 1.442695, %v576_v53 }
 0x140   : > { %v668_v61 = vadd.f32 1.0, %v1016_v57  ;;  %v502_v63 = vadd.f32 %v501_v56, %v1488_v6  ;;  %v1522_v1 = vpop.f32.mrf.mxu0  ;;  %v400_v57 = vadd.f32 %v1492_v10, %v1540_v39 }
 0x141   : > { %v1524_v2 = vpop.f32.mrf.mxu1  ;;  %1029 = vrcp.f32 %v652_v58  ;;  %v561_v4 = vsub.f32 0.0, %v422_v60  ;;  %v480_v60 = vadd.f32 %v1494_v11, %v1540_v39 }
 0x142   : > { %v1018_v0 = vpop.eup %1017  ;;  %1031 = vrcp.f32 %v668_v61  ;;  %v577_v7 = vsub.f32 0.0, %v502_v63  ;;  %v427_v8 = vpop.f32.mrf.mxu0 }
 0x143   : > { %v507_v9 = vpop.f32.mrf.mxu1  ;;  %v1020_v12 = vpop.eup %1019  ;;  %v653_v13 = vadd.f32 1.0, %v1018_v0  ;;  %1033 = vpow2.f32 %v596_v59  ;;  %v598_v14 = vmul.f32 1.442695, %v561_v4  ;;  %v428_v15 = vadd.f32 %v427_v8, %v1488_v6 }
 0x144   : > { %v669_v16 = vadd.f32 1.0, %v1020_v12  ;;  %1035 = vpow2.f32 %v628_v62  ;;  %v630_v17 = vmul.f32 1.442695, %v577_v7  ;;  %v508_v18 = vadd.f32 %v507_v9, %v1488_v6  ;;  %v1528_v19 = vpop.f32.mrf.mxu0 }
 0x145   : > { %v1530_v22 = vpop.f32.mrf.mxu1  ;;  %1037 = vrcp.f32 %v653_v13  ;;  %v562_v24 = vsub.f32 0.0, %v428_v15 }
 0x146   : > { %v1022_v25 = vpop.eup %1021  ;;  %1039 = vrcp.f32 %v669_v16  ;;  %v578_v26 = vsub.f32 0.0, %v508_v18  ;;  %v431_v27 = vpop.f32.mrf.mxu0  ;;  %v404_v16 = vadd.f32 %v1498_v20, %v1540_v39 }
 0x147   : > { %v511_v28 = vpop.f32.mrf.mxu1  ;;  %v1024_v29 = vpop.eup %1023  ;;  %v654_v32 = vadd.f32 1.0, %v1022_v25  ;;  %1041 = vpow2.f32 %v598_v14  ;;  %v600_v33 = vmul.f32 1.442695, %v562_v24  ;;  %v432_v34 = vadd.f32 %v431_v27, %v1488_v6 }
 0x148   : > { %v670_v35 = vadd.f32 1.0, %v1024_v29  ;;  %1043 = vpow2.f32 %v630_v17  ;;  %v632_v36 = vmul.f32 1.442695, %v578_v26  ;;  %v512_v37 = vadd.f32 %v511_v28, %v1488_v6  ;;  %v1535_v38 = vpop.f32.mrf.mxu0 }
 0x149   : > { %v1537_v3 = vpop.f32.mrf.mxu1  ;;  %1045 = vrcp.f32 %v654_v32  ;;  %v563_v42 = vsub.f32 0.0, %v432_v34  ;;  %v484_v24 = vadd.f32 %v1500_v21, %v1540_v39 }
 0x14a   : > { %v1026_v43 = vpop.eup %1025  ;;  %1047 = vrcp.f32 %v670_v35  ;;  %v579_v44 = vsub.f32 0.0, %v512_v37  ;;  %v437_v45 = vpop.f32.mrf.mxu0 }
 0x14b   : > { %v517_v46 = vpop.f32.mrf.mxu1  ;;  %v1028_v47 = vpop.eup %1027  ;;  %v655_v48 = vadd.f32 1.0, %v1026_v43  ;;  %1049 = vpow2.f32 %v600_v33  ;;  %v602_v49 = vmul.f32 1.442695, %v563_v42  ;;  %v438_v52 = vadd.f32 %v437_v45, %v1488_v6 }
 0x14c   : > { %v671_v53 = vadd.f32 1.0, %v1028_v47  ;;  %1051 = vpow2.f32 %v632_v36  ;;  %v634_v54 = vmul.f32 1.442695, %v579_v44  ;;  %v518_v55 = vadd.f32 %v517_v46, %v1488_v6  ;;  %v1544_v5 = vpop.f32.mrf.mxu0 }
 0x14d   : > { %v1546_v56 = vpop.f32.mrf.mxu1  ;;  %1053 = vrcp.f32 %v655_v48  ;;  %v564_v58 = vsub.f32 0.0, %v438_v52  ;;  %v410_v44 = vadd.f32 %v1504_v30, %v1540_v39  ;;  %v490_v48 = vadd.f32 %v1506_v31, %v1540_v39 }
 0x14e   : > { %v1030_v59 = vpop.eup %1029  ;;  %1055 = vrcp.f32 %v671_v53  ;;  %v580_v61 = vsub.f32 0.0, %v518_v55  ;;  %v441_v62 = vpop.f32.mrf.mxu0 }
 0x14f   : > { %v521_v63 = vpop.f32.mrf.mxu1  ;;  %v1032_v4 = vpop.eup %1031  ;;  %v716_v0 = vmul.f32 %v1030_v59, %v400_v57  ;;  %1057 = vpow2.f32 %v602_v49  ;;  %v604_v7 = vmul.f32 1.442695, %v564_v58  ;;  %v442_v8 = vadd.f32 %v441_v62, %v1488_v6 }
 0x150   : > { %v1034_v9 = vpop.eup %1033  ;;  %v732_v12 = vmul.f32 %v1032_v4, %v480_v60  ;;  %1059 = vpow2.f32 %v634_v54  ;;  %v636_v10 = vmul.f32 1.442695, %v580_v61  ;;  %v522_v13 = vadd.f32 %v521_v63, %v1488_v6  ;;  %v1554_v14 = vpop.f32.mrf.mxu0 }
 0x151   : > { %v1556_v11 = vpop.f32.mrf.mxu1  ;;  %v1036_v15 = vpop.eup %1035  ;;  %748 = vst [vmem:[%s1560_s28] sm:$0xff] %v716_v0  ;;  %v656_v17 = vadd.f32 1.0, %v1034_v9  ;;  %1061 = vpow2.f32 %v604_v7  ;;  %v565_v18 = vsub.f32 0.0, %v442_v8  ;;  %v414_v0 = vadd.f32 %v1510_v40, %v1540_v39 }
 0x152   : > { %v1038_v23 = vpop.eup %1037  ;;  %764 = vst [vmem:[%s1560_s28 + $0x80] sm:$0xff] %v732_v12  ;;  %v672_v25 = vadd.f32 1.0, %v1036_v15  ;;  %1063 = vpow2.f32 %v636_v10  ;;  %v581_v26 = vsub.f32 0.0, %v522_v13  ;;  %v447_v27 = vpop.f32.mrf.mxu0  ;;  %v494_v12 = vadd.f32 %v1512_v41, %v1540_v39 }
 0x153   : > { %v527_v28 = vpop.f32.mrf.mxu1  ;;  %v1040_v29 = vpop.eup %1039  ;;  %v717_v32 = vmul.f32 %v1038_v23, %v404_v16  ;;  %1065 = vrcp.f32 %v656_v17  ;;  %v606_v33 = vmul.f32 1.442695, %v565_v18  ;;  %v448_v20 = vadd.f32 %v447_v27, %v1488_v6 }
 0x154   : > { %v1042_v34 = vpop.eup %1041  ;;  %v733_v35 = vmul.f32 %v1040_v29, %v484_v24  ;;  %1067 = vrcp.f32 %v672_v25  ;;  %v638_v36 = vmul.f32 1.442695, %v581_v26  ;;  %v528_v37 = vadd.f32 %v527_v28, %v1488_v6  ;;  %v1570_v21 = vpop.f32.mrf.mxu0 }
 0x155   : > { %v1572_v42 = vpop.f32.mrf.mxu1  ;;  %v1044_v43 = vpop.eup %1043  ;;  %749 = vst [vmem:[%s1560_s28 + $0x8] sm:$0xff] %v717_v32  ;;  %v657_v45 = vadd.f32 1.0, %v1042_v34  ;;  %1069 = vpow2.f32 %v606_v33  ;;  %v566_v46 = vsub.f32 0.0, %v448_v20  ;;  %v420_v32 = vadd.f32 %v1516_v50, %v1540_v39 }
 0x156   : > { %v1046_v47 = vpop.eup %1045  ;;  %765 = vst [vmem:[%s1560_s28 + $0x88] sm:$0xff] %v733_v35  ;;  %v673_v49 = vadd.f32 1.0, %v1044_v43  ;;  %1071 = vpow2.f32 %v638_v36  ;;  %v582_v52 = vsub.f32 0.0, %v528_v37  ;;  %v451_v53 = vpop.f32.mrf.mxu0  ;;  %v500_v35 = vadd.f32 %v1518_v51, %v1540_v39 }
 0x157   : > { %v531_v54 = vpop.f32.mrf.mxu1  ;;  %v1048_v55 = vpop.eup %1047  ;;  %v718_v57 = vmul.f32 %v1046_v47, %v410_v44  ;;  %1073 = vrcp.f32 %v657_v45  ;;  %v608_v58 = vmul.f32 1.442695, %v566_v46  ;;  %v452_v30 = vadd.f32 %v451_v53, %v1488_v6 }
 0x158   : > { %v1050_v59 = vpop.eup %1049  ;;  %v734_v60 = vmul.f32 %v1048_v55, %v490_v48  ;;  %1075 = vrcp.f32 %v673_v49  ;;  %v640_v61 = vmul.f32 1.442695, %v582_v52  ;;  %v532_v62 = vadd.f32 %v531_v54, %v1488_v6  ;;  %v1582_v31 = vpop.f32.mrf.mxu0 }
 0x159   : > { %v1584_v63 = vpop.f32.mrf.mxu1  ;;  %v1052_v4 = vpop.eup %1051  ;;  %750 = vst [vmem:[%s1560_s28 + $0x10] sm:$0xff] %v718_v57  ;;  %v658_v7 = vadd.f32 1.0, %v1050_v59  ;;  %1077 = vpow2.f32 %v608_v58  ;;  %v567_v8 = vsub.f32 0.0, %v452_v30  ;;  %v424_v58 = vadd.f32 %v1522_v1, %v1540_v39 }
 0x15a   : > { %v1054_v9 = vpop.eup %1053  ;;  %766 = vst [vmem:[%s1560_s28 + $0x90] sm:$0xff] %v734_v60  ;;  %v674_v10 = vadd.f32 1.0, %v1052_v4  ;;  %1079 = vpow2.f32 %v640_v61  ;;  %v583_v13 = vsub.f32 0.0, %v532_v62  ;;  %v457_v15 = vpop.f32.mrf.mxu0  ;;  %v504_v61 = vadd.f32 %v1524_v2, %v1540_v39 }
 0x15b   : > { %v537_v16 = vpop.f32.mrf.mxu1  ;;  %v1056_v17 = vpop.eup %1055  ;;  %v719_v18 = vmul.f32 %v1054_v9, %v414_v0  ;;  %1081 = vrcp.f32 %v658_v7  ;;  %v610_v23 = vmul.f32 1.442695, %v567_v8  ;;  %v458_v40 = vadd.f32 %v457_v15, %v1488_v6 }
 0x15c   : > { %v1058_v24 = vpop.eup %1057  ;;  %v735_v25 = vmul.f32 %v1056_v17, %v494_v12  ;;  %1083 = vrcp.f32 %v674_v10  ;;  %v642_v26 = vmul.f32 1.442695, %v583_v13  ;;  %v538_v27 = vadd.f32 %v537_v16, %v1488_v6  ;;  %v1594_v41 = vpop.f32.mrf.mxu0 }
 0x15d   : > { %v1596_v28 = vpop.f32.mrf.mxu1  ;;  %v1060_v29 = vpop.eup %1059  ;;  %751 = vst [vmem:[%s1560_s28 + $0x18] sm:$0xff] %v719_v18  ;;  %v659_v33 = vadd.f32 1.0, %v1058_v24  ;;  %1085 = vpow2.f32 %v610_v23  ;;  %v568_v20 = vsub.f32 0.0, %v458_v40  ;;  %v430_v23 = vadd.f32 %v1528_v19, %v1540_v39 }
 0x15e   : > { %v1062_v34 = vpop.eup %1061  ;;  %767 = vst [vmem:[%s1560_s28 + $0x98] sm:$0xff] %v735_v25  ;;  %v675_v36 = vadd.f32 1.0, %v1060_v29  ;;  %1087 = vpow2.f32 %v642_v26  ;;  %v584_v37 = vsub.f32 0.0, %v538_v27  ;;  %v461_v43 = vpop.f32.mrf.mxu0  ;;  %v510_v26 = vadd.f32 %v1530_v22, %v1540_v39 }
 0x15f   : > { %v541_v44 = vpop.f32.mrf.mxu1  ;;  %v1064_v45 = vpop.eup %1063  ;;  %1089 = vrcp.f32 %v659_v33  ;;  %v660_v46 = vadd.f32 1.0, %v1062_v34  ;;  %v612_v47 = vmul.f32 1.442695, %v568_v20  ;;  %v462_v48 = vadd.f32 %v461_v43, %v1488_v6 }
 0x160   : > { %v1066_v50 = vpop.eup %1065  ;;  %1091 = vrcp.f32 %v675_v36  ;;  %v676_v49 = vadd.f32 1.0, %v1064_v45  ;;  %v644_v52 = vmul.f32 1.442695, %v584_v37  ;;  %v542_v53 = vadd.f32 %v541_v44, %v1488_v6  ;;  %v1606_v54 = vpop.f32.mrf.mxu0 }
 0x161   : > { %v1608_v51 = vpop.f32.mrf.mxu1  ;;  %v1068_v55 = vpop.eup %1067  ;;  %v720_v57 = vmul.f32 %v1066_v50, %v420_v32  ;;  %1093 = vrcp.f32 %v660_v46  ;;  %v569_v30 = vsub.f32 0.0, %v462_v48 }
 0x162   : > { %v1070_v59 = vpop.eup %1069  ;;  %v736_v60 = vmul.f32 %v1068_v55, %v500_v35  ;;  %1095 = vrcp.f32 %v676_v49  ;;  %v585_v62 = vsub.f32 0.0, %v542_v53  ;;  %v467_v4 = vpop.f32.mrf.mxu0  ;;  %v434_v49 = vadd.f32 %v1535_v38, %v1540_v39 }
 0x163   : > { %v547_v0 = vpop.f32.mrf.mxu1  ;;  %v1072_v7 = vpop.eup %1071  ;;  %752 = vst [vmem:[%s1560_s28 + $0x20] sm:$0xff] %v720_v57  ;;  %v661_v8 = vadd.f32 1.0, %v1070_v59  ;;  %1097 = vpow2.f32 %v612_v47  ;;  %v614_v9 = vmul.f32 1.442695, %v569_v30  ;;  %v468_v12 = vadd.f32 %v467_v4, %v1488_v6 }
 0x164   : > { %v1074_v1 = vpop.eup %1073  ;;  %768 = vst [vmem:[%s1560_s28 + $0xa0] sm:$0xff] %v736_v60  ;;  %v677_v10 = vadd.f32 1.0, %v1072_v7  ;;  %1099 = vpow2.f32 %v644_v52  ;;  %v646_v13 = vmul.f32 1.442695, %v585_v62  ;;  %v548_v15 = vadd.f32 %v547_v0, %v1488_v6  ;;  %v1618_v2 = vpop.f32.mrf.mxu0 }
 0x165   : > { %v1620_v16 = vpop.f32.mrf.mxu1  ;;  %v1076_v17 = vpop.eup %1075  ;;  %v721_v18 = vmul.f32 %v1074_v1, %v424_v58  ;;  %1101 = vrcp.f32 %v661_v8  ;;  %v570_v40 = vsub.f32 0.0, %v468_v12  ;;  %v440_v60 = vadd.f32 %v1544_v5, %v1540_v39 }
 0x166   : > { %v1078_v24 = vpop.eup %1077  ;;  %v737_v25 = vmul.f32 %v1076_v17, %v504_v61  ;;  %1103 = vrcp.f32 %v677_v10  ;;  %v586_v27 = vsub.f32 0.0, %v548_v15  ;;  %v471_v29 = vpop.f32.mrf.mxu0  ;;  %v520_v62 = vadd.f32 %v1546_v56, %v1540_v39 }
 0x167   : > { %v551_v32 = vpop.f32.mrf.mxu1  ;;  %v1080_v33 = vpop.eup %1079  ;;  %753 = vst [vmem:[%s1560_s28 + $0x28] sm:$0xff] %v721_v18  ;;  %v662_v20 = vadd.f32 1.0, %v1078_v24  ;;  %1105 = vpow2.f32 %v614_v9  ;;  %v616_v34 = vmul.f32 1.442695, %v570_v40  ;;  %v472_v35 = vadd.f32 %v471_v29, %v1488_v6 }
 0x168   : > { %v1082_v19 = vpop.eup %1081  ;;  %769 = vst [vmem:[%s1560_s28 + $0xa8] sm:$0xff] %v737_v25  ;;  %v678_v36 = vadd.f32 1.0, %v1080_v33  ;;  %1107 = vpow2.f32 %v646_v13  ;;  %v648_v37 = vmul.f32 1.442695, %v586_v27  ;;  %v552_v43 = vadd.f32 %v551_v32, %v1488_v6 }
 0x169   : > { %v1084_v22 = vpop.eup %1083  ;;  %v722_v44 = vmul.f32 %v1082_v19, %v430_v23  ;;  %1109 = vrcp.f32 %v662_v20  ;;  %v571_v45 = vsub.f32 0.0, %v472_v35  ;;  %v514_v6 = vadd.f32 %v1537_v3, %v1540_v39 }
 0x16a   : > { %v1086_v46 = vpop.eup %1085  ;;  %v738_v47 = vmul.f32 %v1084_v22, %v510_v26  ;;  %1111 = vrcp.f32 %v678_v36  ;;  %v587_v48 = vsub.f32 0.0, %v552_v43  ;;  %v444_v5 = vadd.f32 %v1554_v14, %v1540_v39 }
 0x16b   : > { %v1088_v50 = vpop.eup %1087  ;;  %754 = vst [vmem:[%s1560_s28 + $0x30] sm:$0xff] %v722_v44  ;;  %v663_v52 = vadd.f32 1.0, %v1086_v46  ;;  %1113 = vpow2.f32 %v616_v34  ;;  %v618_v53 = vmul.f32 1.442695, %v571_v45  ;;  %v524_v56 = vadd.f32 %v1556_v11, %v1540_v39 }
 0x16c   : > { %v1090_v55 = vpop.eup %1089  ;;  %770 = vst [vmem:[%s1560_s28 + $0xb0] sm:$0xff] %v738_v47  ;;  %v679_v57 = vadd.f32 1.0, %v1088_v50  ;;  %1115 = vpow2.f32 %v648_v37  ;;  %v650_v58 = vmul.f32 1.442695, %v587_v48  ;;  %v450_v14 = vadd.f32 %v1570_v21, %v1540_v39 }
 0x16d   : > { %v1092_v30 = vpop.eup %1091  ;;  %v723_v59 = vmul.f32 %v1090_v55, %v434_v49  ;;  %1117 = vrcp.f32 %v663_v52  ;;  %v530_v11 = vadd.f32 %v1572_v42, %v1540_v39  ;;  %v454_v21 = vadd.f32 %v1582_v31, %v1540_v39 }
 0x16e   : > { %v1094_v38 = vpop.eup %1093  ;;  %v739_v61 = vmul.f32 %v1092_v30, %v514_v6  ;;  %1119 = vrcp.f32 %v679_v57  ;;  %v534_v42 = vadd.f32 %v1584_v63, %v1540_v39  ;;  %v460_v44 = vadd.f32 %v1594_v41, %v1540_v39  ;;  %v473_v57 = vpop.f32.mrf.mxu0 }
 0x16f   : > { %v1096_v4 = vpop.eup %1095  ;;  %755 = vst [vmem:[%s1560_s28 + $0x38] sm:$0xff] %v723_v59  ;;  %v724_v3 = vmul.f32 %v1094_v38, %v440_v60  ;;  %1121 = vpow2.f32 %v618_v53  ;;  %v540_v45 = vadd.f32 %v1596_v28, %v1540_v39  ;;  %v464_v50 = vadd.f32 %v1606_v54, %v1540_v39 }
 0x170   : > { %v1098_v0 = vpop.eup %1097  ;;  %771 = vst [vmem:[%s1560_s28 + $0xb8] sm:$0xff] %v739_v61  ;;  %v740_v7 = vmul.f32 %v1096_v4, %v520_v62  ;;  %1123 = vpow2.f32 %v650_v58  ;;  %v544_v41 = vadd.f32 %v1608_v51, %v1540_v39  ;;  %v470_v55 = vadd.f32 %v1618_v2, %v1540_v39  ;;  %v553_v51 = vpop.f32.mrf.mxu1 }
 0x171   : > { %v1100_v8 = vpop.eup %1099  ;;  %756 = vst [vmem:[%s1560_s28 + $0x40] sm:$0xff] %v724_v3  ;;  %v664_v9 = vadd.f32 1.0, %v1098_v0  ;;  %v550_v54 = vadd.f32 %v1620_v16, %v1540_v39  ;;  %v474_v60 = vadd.f32 %v473_v57, %v1540_v39  ;;  %v554_v38 = vadd.f32 %v553_v51, %v1540_v39 }
 0x172   : > { %v1102_v12 = vpop.eup %1101  ;;  %772 = vst [vmem:[%s1560_s28 + $0xc0] sm:$0xff] %v740_v7  ;;  %v680_v1 = vadd.f32 1.0, %v1100_v8 }
 0x173   : > { %v1104_v10 = vpop.eup %1103  ;;  %v725_v13 = vmul.f32 %v1102_v12, %v444_v5  ;;  %1125 = vrcp.f32 %v664_v9 }
 0x174   : > { %v1106_v15 = vpop.eup %1105  ;;  %v741_v17 = vmul.f32 %v1104_v10, %v524_v56  ;;  %1127 = vrcp.f32 %v680_v1 }
 0x175   : > { %v1108_v18 = vpop.eup %1107  ;;  %757 = vst [vmem:[%s1560_s28 + $0x48] sm:$0xff] %v725_v13  ;;  %v665_v23 = vadd.f32 1.0, %v1106_v15 }
 0x176   : > { %v1110_v40 = vpop.eup %1109  ;;  %773 = vst [vmem:[%s1560_s28 + $0xc8] sm:$0xff] %v741_v17  ;;  %v681_v24 = vadd.f32 1.0, %v1108_v18 }
 0x177   : > { %v1112_v25 = vpop.eup %1111  ;;  %v726_v26 = vmul.f32 %v1110_v40, %v450_v14  ;;  %1129 = vrcp.f32 %v665_v23 }
 0x178   : > { %v1114_v27 = vpop.eup %1113  ;;  %v742_v29 = vmul.f32 %v1112_v25, %v530_v11  ;;  %1131 = vrcp.f32 %v681_v24 }
 0x179   : > { %v1116_v32 = vpop.eup %1115  ;;  %758 = vst [vmem:[%s1560_s28 + $0x50] sm:$0xff] %v726_v26  ;;  %v666_v33 = vadd.f32 1.0, %v1114_v27 }
 0x17a   : > { %v1118_v20 = vpop.eup %1117  ;;  %774 = vst [vmem:[%s1560_s28 + $0xd0] sm:$0xff] %v742_v29  ;;  %v682_v34 = vadd.f32 1.0, %v1116_v32 }
 0x17b   : > { %v1120_v35 = vpop.eup %1119  ;;  %v727_v19 = vmul.f32 %v1118_v20, %v454_v21  ;;  %1133 = vrcp.f32 %v666_v33 }
 0x17c   : > { %v1122_v36 = vpop.eup %1121  ;;  %v743_v37 = vmul.f32 %v1120_v35, %v534_v42  ;;  %1135 = vrcp.f32 %v682_v34 }
 0x17d   : > { %v1124_v43 = vpop.eup %1123  ;;  %759 = vst [vmem:[%s1560_s28 + $0x58] sm:$0xff] %v727_v19  ;;  %v667_v22 = vadd.f32 1.0, %v1122_v36 }
 0x17e   : > { %775 = vst [vmem:[%s1560_s28 + $0xd8] sm:$0xff] %v743_v37  ;;  %v683_v31 = vadd.f32 1.0, %v1124_v43 }
 0x17f   : > { %1137 = vrcp.f32 %v667_v22 }
 0x180   : > { %v1126_v63 = vpop.eup %1125  ;;  %1139 = vrcp.f32 %v683_v31 }
 0x181   : > { %v1128_v46 = vpop.eup %1127  ;;  %v728_v47 = vmul.f32 %v1126_v63, %v460_v44 }
 0x182   : > { %v744_v48 = vmul.f32 %v1128_v46, %v540_v45 }
 0x183   : > { %760 = vst [vmem:[%s1560_s28 + $0x60] sm:$0xff] %v728_v47 }
 0x184   : > { %v1130_v49 = vpop.eup %1129  ;;  %776 = vst [vmem:[%s1560_s28 + $0xe0] sm:$0xff] %v744_v48 }
 0x185   : > { %v1132_v52 = vpop.eup %1131  ;;  %v729_v53 = vmul.f32 %v1130_v49, %v464_v50 }
 0x186   : > { %v745_v28 = vmul.f32 %v1132_v52, %v544_v41 }
 0x187   : > { %761 = vst [vmem:[%s1560_s28 + $0x68] sm:$0xff] %v729_v53 }
 0x188   : > { %v1134_v6 = vpop.eup %1133  ;;  %777 = vst [vmem:[%s1560_s28 + $0xe8] sm:$0xff] %v745_v28 }
 0x189   : > { %v1136_v58 = vpop.eup %1135  ;;  %v730_v30 = vmul.f32 %v1134_v6, %v470_v55 }
 0x18a   : > { %v746_v59 = vmul.f32 %v1136_v58, %v550_v54 }
 0x18b   : > { %762 = vst [vmem:[%s1560_s28 + $0x70] sm:$0xff] %v730_v30 }
 0x18c   : > { %v1138_v2 = vpop.eup %1137  ;;  %778 = vst [vmem:[%s1560_s28 + $0xf0] sm:$0xff] %v746_v59 }
 0x18d   : > { %v1140_v61 = vpop.eup %1139  ;;  %v731_v16 = vmul.f32 %v1138_v2, %v474_v60 }
 0x18e   : > { %v747_v62 = vmul.f32 %v1140_v61, %v554_v38 }
 0x18f   : > { %763 = vst [vmem:[%s1560_s28 + $0x78] sm:$0xff] %v731_v16 }
 0x190   : > { %779 = vst [vmem:[%s1560_s28 + $0xf8] sm:$0xff] %v747_v62 }
 0x191   : > { %1208 = shalt.err (!%p1205_p0)
}
 0x192   : > { %s1209_s11 = scalar_lea.hbm %s1687_s4, 4096  ;;  %s1213_s30 = scalar_lea.hbm %s1737_s3, 8192 }
 0x193   : > { %p1210_p5 = scmp.ne.s32.totalorder %s1687_s4, %s1209_s11  ;;  %p1214_p4 = scmp.lt.s32.totalorder %s1687_s4, %s1737_s3 }
 0x194   : > { %p1215_p6 = scmp.lt.s32.totalorder %s1213_s30, %s1209_s11 }
 0x195   : > { %p1211_p2 = pnand %p1210_p5, %p1753_p11 }
 0x196   : > { %p1216_p8 = por %p1215_p6, %p1214_p4 }
 0x197   : > { %p1212_p1 = pneg %p1211_p2 }
 0x199   : > { %p1217_p3 = pnand %p1216_p8, %p1212_p1 }
 0x19b   : > { %1220 = shalt.err (!%p1217_p3)
}
 0x19c   : > { %s1271_s20 = smov 128   ;;  %s1272_s28 = smov 8  }
 0x19d   : > { %933 = dma.vmem_to_hbm [thread:$0]  (%p1753_p11), %s1689_s17, 4096, %s1687_s4, %s781_s16, %s1271_s20, %s1271_s20, %s1272_s28  }
 0x19e PF: > { %s809_s29 = sand.u32 1, %s1251_s12   ;;  %p1754_p7 = scmp.ne.s32.totalorder %s1743_s19, 0 }
 0x19f   : > { %p1755_p9 = scmp.ge.s32.totalorder %s1263_s15, 2  ;;  %s810_s22 = scalar_lea.sflag [#allocation4], %s809_s29 }
 0x1a1   : > { %p944_p10 = pnand %p1755_p9, %p1754_p7 }
 0x1a3   : > { %p945_p12 = pneg %p944_p10 }
 0x1a5   : > { %1246 = dma.done.wait (%p945_p12), %s810_s22, 4096  }
 0x1a6   : > { %1248 = vsyncadd (%p945_p12), %s810_s22, 4294963200  ;;  %p17_p13 = scmp.ge.s32.totalorder %s1347_s24, 4   ;;  %s1756_s12 = smov %s1255_s13 }
 0x1a7   : > { %s1757_s13 = smov %s1259_s14  ;;  %s1758_s14 = smov %s1367_s5 }
 0x1a8   : > { %s1759_s15 = smov %s1347_s24  ;;  %19 = sbr.rel (!%p17_p13) target bundleno = 6 (0x6), region = 81 }
 0x1ad   :  { %815 = vsyncpa [#allocation3], 1 }
 0x1ae   :  { %817 = vsyncpa [#allocation3 + $0x1], 1 }
 0x1af   :  { %818 = vsyncpa [#allocation6], 1 }
 0x1b0   :  { %819 = vsyncpa [#allocation4], 1 }
 0x1b1   :  { %821 = vsyncpa [#allocation4 + $0x1], 1 }

</bundles_post_ra>
